<compile_context>
chip_gen: v6e
topology: v6e:2x2x1
jax: 0.10.0
libtpu: 0.0.40
codegen_flags: <defaults>
</compile_context>

<pallas_src>
import math

import numpy as np
import jax
import jax.numpy as jnp
from jax.experimental import pallas as pl
from jax.experimental.pallas import tpu as pltpu


# ---------------- static model configuration (AuditoryModel defaults) -------
FS = 20000            # sampling frequency
N_CH = 16             # gammatone channels (filterbank.fc)
GT_LEN = 128          # gammatone FIR length (6.4 ms @ 20 kHz)
LP_LEN = 64           # truncated-IIR FIR length for the IHC lowpass
LP_FC = 1000.0        # IHC lowpass cutoff (Hz)
OUTPUT_SCALE = 1.0
X_OFF = 128           # left zero-pad of the input (>= GT_LEN - 1, lane aligned)

# First-order lowpass y[t] = (1-a) x[t] + a y[t-1]  ==  FIR with taps (1-a) a^k
# (truncated at LP_LEN taps; a^64 ~ 2e-9, i.e. exact to f32).
_LP_A = math.exp(-2.0 * math.pi * LP_FC / FS)
LP_TAPS = tuple((1.0 - _LP_A) * _LP_A ** k for k in range(LP_LEN))


# ---------------- filterbank construction (static, trace-time numpy) --------
def _erbspace(fmin, fmax, n):
    hz_to_erb = lambda f: 21.4 * np.log10(1.0 + 0.00437 * f)
    erb_to_hz = lambda e: (10.0 ** (e / 21.4) - 1.0) / 0.00437
    return erb_to_hz(np.linspace(hz_to_erb(fmin), hz_to_erb(fmax), n))


def _gammatone_fir(fmin=250.0, fmax=8000.0):
    # TODO(synk): exact gammatone parametrization (fc grid, normalization) of
    # the cnrhlc FilterbankRegistry entry is not in the spec; a standard
    # 4th-order gammatone FIR with unit gain at fc is used instead.
    fc = _erbspace(fmin, fmax, N_CH)                              # (C,)
    t = (np.arange(GT_LEN) + 0.5) / FS                            # (L,)
    erb = 24.7 * (4.37 * fc / 1000.0 + 1.0)
    env = t[None, :] ** 3 * np.exp(-2.0 * np.pi * 1.019 * erb[:, None] * t[None, :])
    g = env * np.cos(2.0 * np.pi * fc[:, None] * t[None, :])
    z = np.exp(-2j * np.pi * fc[:, None] * t[None, :])
    gain = np.abs((g * z).sum(axis=-1))
    g = g / np.maximum(gain, 1e-12)[:, None]
    return fc.astype(np.float32), g.astype(np.float32)


def _lowpass_band_matrix(T):
    """Static banded Toeplitz matrix so the IHC lowpass runs on the MXU.

    acc[c, t] = sum_k taps[k] * r[c, t-k]  ==  r @ W   with W[s, t] = taps[t-s].
    For very large T this should be blocked into per-128-lane band blocks
    instead of a dense (T, T) constant (v7x VMEM note in the review).
    """
    s = np.arange(T)[:, None]
    t = np.arange(T)[None, :]
    d = t - s
    taps = np.asarray(LP_TAPS, np.float32)
    w = np.where((d >= 0) & (d < LP_LEN), taps[np.clip(d, 0, LP_LEN - 1)], 0.0)
    return w.astype(np.float32)


# ---------------- audiogram -> OHC/IHC loss (plain JAX, tiny work) ----------
_MAX_OHC_LOSS = np.array(
    [[250, 18.591860217178], [375, 23.0653774100513], [500, 25.2602607820868],
     [750, 30.7013288310918], [1000, 34.0272671055467], [1500, 38.675265569939],
     [2000, 39.5318838824221], [3000, 39.4930128714544], [4000, 39.3156363872299],
     [6000, 40.5210536471565]], dtype=np.float32)


def audiogram_to_ohc_ihc_loss(audiogram, freqs):
    """JAX port of the torch helper (intentionally not a Pallas kernel)."""
    # TODO(synk): torch `linear_interpolation` edge behavior unknown; jnp.interp
    # clamps to edge values.
    logf = jnp.log10(freqs)
    max_ohc = jnp.interp(logf,
                         jnp.log10(jnp.asarray(_MAX_OHC_LOSS[:, 0])),
                         jnp.asarray(_MAX_OHC_LOSS[:, 1]))
    max_ohc = jnp.clip(max_ohc, 0.0, 105.0)
    total = jax.vmap(lambda ag: jnp.interp(logf, jnp.log10(ag[:, 0]), ag[:, 1]))(audiogram)
    total = jnp.clip(total, 0.0, 105.0)
    ohc_db = jnp.minimum(2.0 / 3.0 * total, max_ohc)
    ihc_db = total - ohc_db
    return 10.0 ** (-ohc_db / 20.0), 10.0 ** (-ihc_db / 20.0)


# ---------------- the fused auditory-model kernel ----------------------------
def _auditory_kernel(xp_ref, h_ref, wlp_ref, ohc_ref, ihc_ref, o_ref, xb_ref):
    Bb, C, T = o_ref.shape
    tpad = xp_ref.shape[-1]

    h = h_ref[...]          # (C, GT_LEN) gammatone FIR matrix (VMEM resident)
    wlp = wlp_ref[...]      # (T, T) banded lowpass matrix (VMEM resident)

    for b in range(Bb):     # unrolled batch block (amortizes per-step overhead)
        # Fold the per-channel OHC gain into the small filter matrix
        # (16x128, 2 vregs) instead of scaling the 16xT filterbank output.
        h_scaled = h * ohc_ref[b]                                     # (C, L)

        # Toeplitz frame matrix frames[l, t] = x_pad[X_OFF + t - l]:
        # one dense aligned sublane-broadcast store + one strided lane-roll.
        xb_ref[...] = jnp.broadcast_to(xp_ref[b], (GT_LEN, tpad))     # (L, tpad)
        frames = pltpu.roll(xb_ref[...], shift=tpad - X_OFF, axis=1,
                            stride=1, stride_axis=0)[:, :T]           # (L, T)

        # Gammatone filterbank as one MXU matmul.
        y = jnp.dot(h_scaled, frames, preferred_element_type=jnp.float32)  # (C, T)

        # IHC 'hwrlp': half-wave rectification + 1st-order lowpass, with the
        # 64-tap lowpass realised as a banded Toeplitz matmul on the MXU.
        r = jnp.maximum(y, 0.0)
        acc = jnp.dot(r, wlp, preferred_element_type=jnp.float32)         # (C, T)

        # IHC loss gain (applied after transduction, as in AuditoryModel.forward).
        acc = acc * ihc_ref[b]

        # 'log' adaptation (log1p for f32 precision at small values).
        # TODO(synk): exact parametrization of the 'log' AdaptationRegistry
        # entry is not in the spec; log(1 + x) compression used.
        # 'none' modulation = identity, then output scaling.
        o_ref[b] = (OUTPUT_SCALE * jnp.log1p(acc)).astype(o_ref.dtype)


def _pick_batch_block(B):
    # Amortize the ~0.35us per-grid-step overhead for larger batches, while
    # keeping >= 2 grid steps so v7x's two TensorCores both get work.
    for bb in (8, 4, 2):
        if B % bb == 0 and B // bb >= 2:
            return bb
    return 1


# ---------------- wrapper -----------------------------------------------------
def auditory_model(x, audiogram=None):
    """Forward pass: gammatone -> hwrlp IHC -> (ihc loss) -> log adaptation."""
    x = jnp.asarray(x, jnp.float32)
    assert x.ndim == 2, "expected (batch, time) input"
    B, T = x.shape
    assert T % 128 == 0, "time length must be a multiple of 128 (lane-dense tiling)"

    fc, h_np = _gammatone_fir()
    h = jnp.asarray(h_np)                                            # (C, GT_LEN)
    w_lp = jnp.asarray(_lowpass_band_matrix(T))                      # (T, T)

    if audiogram is None:
        ohc = jnp.ones((B, N_CH), jnp.float32)
        ihc = jnp.ones((B, N_CH), jnp.float32)
    else:
        ohc, ihc = audiogram_to_ohc_ihc_loss(jnp.asarray(audiogram, jnp.float32),
                                             jnp.asarray(fc))
    ohc = ohc.astype(jnp.float32)[:, :, None]                        # (B, C, 1)
    ihc = ihc.astype(jnp.float32)[:, :, None]                        # (B, C, 1)

    x_pad = jnp.pad(x, ((0, 0), (X_OFF, 0)))[:, None, :]             # (B, 1, X_OFF+T)
    tpad = X_OFF + T
    bb = _pick_batch_block(B)

    return pl.pallas_call(
        _auditory_kernel,
        out_shape=jax.ShapeDtypeStruct((B, N_CH, T), jnp.float32),
        grid_spec=pltpu.PrefetchScalarGridSpec(
            num_scalar_prefetch=0,
            grid=(B // bb,),
            in_specs=[
                pl.BlockSpec((bb, 1, tpad), lambda i: (i, 0, 0)),      # padded signal
                pl.BlockSpec((N_CH, GT_LEN), lambda i: (0, 0)),        # gammatone FIR
                pl.BlockSpec((T, T), lambda i: (0, 0)),                # lowpass band matrix
                pl.BlockSpec((bb, N_CH, 1), lambda i: (i, 0, 0)),      # OHC gain
                pl.BlockSpec((bb, N_CH, 1), lambda i: (i, 0, 0)),      # IHC gain
            ],
            out_specs=pl.BlockSpec((bb, N_CH, T), lambda i: (i, 0, 0)),
            scratch_shapes=[
                pltpu.VMEM((GT_LEN, tpad), jnp.float32),               # broadcast buffer
            ],
        ),
        compiler_params=pltpu.CompilerParams(
            dimension_semantics=("parallel",),
        ),
    )(x_pad, h, w_lp, ohc, ihc)


# ---------------- pure-JAX reference (tap loops only, precision neutral) -----
def _reference_forward(x, audiogram):
    fc, h_np = _gammatone_fir()
    h = jnp.asarray(h_np)
    ohc, ihc = audiogram_to_ohc_ihc_loss(jnp.asarray(audiogram, jnp.float32),
                                         jnp.asarray(fc))
    B, T = x.shape
    xp = jnp.pad(x, ((0, 0), (X_OFF, 0)))
    # Gammatone FIR as an explicit tap loop (no dot -> exact f32 reference).
    y = jnp.zeros((B, N_CH, T), jnp.float32)
    for l in range(GT_LEN):
        y = y + h[None, :, l:l + 1] * xp[:, None, X_OFF - l:X_OFF - l + T]
    y = y * ohc[:, :, None]
    r = jnp.maximum(y, 0.0)
    rp = jnp.pad(r, ((0, 0), (0, 0), (LP_LEN, 0)))
    acc = jnp.zeros_like(r)
    for k in range(LP_LEN):
        acc = acc + LP_TAPS[k] * rp[:, :, LP_LEN - k:LP_LEN - k + T]
    acc = acc * ihc[:, :, None]
    return OUTPUT_SCALE * jnp.log1p(acc)


if __name__ == "__main__":
    key = jax.random.PRNGKey(0)
    k_x, k_a = jax.random.split(key)

    B, T = 2, 512
    x = jax.random.normal(k_x, (B, T), dtype=jnp.float32)

    ag_freqs = jnp.array([250., 500., 1000., 2000., 3000., 4000., 6000., 8000.],
                         dtype=jnp.float32)
    ag_loss = jax.random.uniform(k_a, (B, ag_freqs.shape[0]),
                                 minval=0.0, maxval=60.0, dtype=jnp.float32)
    audiogram = jnp.stack(
        [jnp.broadcast_to(ag_freqs, (B, ag_freqs.shape[0])), ag_loss], axis=-1)  # (B,8,2)

    y = auditory_model(x, audiogram)
    jax.block_until_ready(y)

    assert y.shape == (B, N_CH, T) and y.dtype == jnp.float32
    assert bool(jnp.all(jnp.isfinite(y)))

    y_ref = _reference_forward(x, audiogram)
    assert bool(jnp.allclose(y, y_ref, rtol=1e-5, atol=1e-5)), (
        float(jnp.max(jnp.abs(y - y_ref))))

    print("KERNEL_OK")
</pallas_src>

<mosaic_0001>
module attributes {stable_mosaic.version = 11 : i64} {
  func.func @_auditory_kernel(%arg0: i32, %arg1: memref<1x1x640xf32, #tpu.memory_space<vmem>>, %arg2: memref<16x128xf32, #tpu.memory_space<vmem>>, %arg3: memref<512x512xf32, #tpu.memory_space<vmem>>, %arg4: memref<1x16x1xf32, #tpu.memory_space<vmem>>, %arg5: memref<1x16x1xf32, #tpu.memory_space<vmem>>, %arg6: memref<1x16x512xf32, #tpu.memory_space<vmem>>, %arg7: memref<128x640xf32, #tpu.memory_space<vmem>>) attributes {dimension_semantics = [#tpu.dimension_semantics<parallel>], iteration_bounds = array<i64: 2>, scalar_prefetch = 0 : i64, scratch_operands = 1 : i64, tpu.core_type = #tpu.core_type<tc>, window_params = [{transform_indices = @transform_0, window_bounds = array<i64: 1, 1, 640>}, {pipeline_mode = #tpu.pipeline_mode<synchronous>, transform_indices = @transform_1, window_bounds = array<i64: 16, 128>}, {pipeline_mode = #tpu.pipeline_mode<synchronous>, transform_indices = @transform_2, window_bounds = array<i64: 512, 512>}, {transform_indices = @transform_3, window_bounds = array<i64: 1, 16, 1>}, {transform_indices = @transform_4, window_bounds = array<i64: 1, 16, 1>}, {transform_indices = @transform_5, window_bounds = array<i64: 1, 16, 512>}]} {
    %c0 = arith.constant 0 : index
    %c0_0 = arith.constant 0 : index
    %0 = vector.load %arg2[%c0, %c0_0] : memref<16x128xf32, #tpu.memory_space<vmem>>, vector<16x128xf32>
    %c0_1 = arith.constant 0 : index
    %c0_2 = arith.constant 0 : index
    %1 = vector.load %arg3[%c0_1, %c0_2] : memref<512x512xf32, #tpu.memory_space<vmem>>, vector<512x512xf32>
    %c0_3 = arith.constant 0 : index
    %c0_4 = arith.constant 0 : index
    %c0_5 = arith.constant 0 : index
    %2 = vector.load %arg4[%c0_3, %c0_4, %c0_5] : memref<1x16x1xf32, #tpu.memory_space<vmem>>, vector<1x16x1xf32>
    %3 = vector.shape_cast %2 : vector<1x16x1xf32> to vector<16x1xf32>
    %4 = vector.broadcast %3 : vector<16x1xf32> to vector<16x128xf32>
    %5 = arith.mulf %0, %4 : vector<16x128xf32>
    %c0_6 = arith.constant 0 : index
    %c0_7 = arith.constant 0 : index
    %c0_8 = arith.constant 0 : index
    %6 = vector.load %arg1[%c0_6, %c0_7, %c0_8] : memref<1x1x640xf32, #tpu.memory_space<vmem>>, vector<1x1x640xf32>
    %7 = vector.shape_cast %6 : vector<1x1x640xf32> to vector<1x640xf32>
    %8 = vector.shape_cast %7 : vector<1x640xf32> to vector<1x640xf32>
    %9 = vector.broadcast %8 : vector<1x640xf32> to vector<128x640xf32>
    %c0_9 = arith.constant 0 : index
    %c0_10 = arith.constant 0 : index
    %10 = vector.load %arg7[%c0_9, %c0_10] : memref<128x640xf32, #tpu.memory_space<vmem>>, vector<128x640xf32>
    tpu.vector_store %arg7[%c0_9, %c0_10], %9 {strides = array<i32>} : memref<128x640xf32, #tpu.memory_space<vmem>>, vector<128x640xf32>,
    %c0_11 = arith.constant 0 : index
    %c0_12 = arith.constant 0 : index
    %11 = vector.load %arg7[%c0_11, %c0_12] : memref<128x640xf32, #tpu.memory_space<vmem>>, vector<128x640xf32>
    %c512_i32 = arith.constant 512 : i32
    %12 = tpu.dynamic_rotate %11 by %c512_i32 dim 1 {stride = 1 : si32, stride_dimension = 0 : si32} : vector<128x640xf32>, i32 -> vector<128x640xf32>
    %13 = vector.extract_strided_slice %12 {offsets = [0, 0], sizes = [128, 512], strides = [1, 1]} : vector<128x640xf32> to vector<128x512xf32>
    %cst = arith.constant dense<0.000000e+00> : vector<16x512xf32>
    %14 = tpu.matmul %5, %13, %cst {dimension_numbers = #tpu.dot_dimension_numbers<[1], [0], [0], [1], [0, 0, 1, 1], [], []>} : vector<16x128xf32>, vector<128x512xf32>, vector<16x512xf32> -> vector<16x512xf32>
    %cst_13 = arith.constant 0.000000e+00 : f32
    %15 = vector.broadcast %cst_13 : f32 to vector<16x512xf32>
    %16 = arith.maximumf %14, %15 : vector<16x512xf32>
    %cst_14 = arith.constant dense<0.000000e+00> : vector<16x512xf32>
    %17 = tpu.matmul %16, %1, %cst_14 {dimension_numbers = #tpu.dot_dimension_numbers<[1], [0], [0], [1], [0, 0, 1, 1], [], []>} : vector<16x512xf32>, vector<512x512xf32>, vector<16x512xf32> -> vector<16x512xf32>
    %c0_15 = arith.constant 0 : index
    %c0_16 = arith.constant 0 : index
    %c0_17 = arith.constant 0 : index
    %18 = vector.load %arg5[%c0_15, %c0_16, %c0_17] : memref<1x16x1xf32, #tpu.memory_space<vmem>>, vector<1x16x1xf32>
    %19 = vector.shape_cast %18 : vector<1x16x1xf32> to vector<16x1xf32>
    %20 = vector.broadcast %19 : vector<16x1xf32> to vector<16x512xf32>
    %21 = arith.mulf %17, %20 : vector<16x512xf32>
    %22 = math.log1p %21 : vector<16x512xf32>
    %cst_18 = arith.constant 1.000000e+00 : f32
    %23 = vector.broadcast %cst_18 : f32 to vector<16x512xf32>
    %24 = arith.mulf %23, %22 : vector<16x512xf32>
    %c0_19 = arith.constant 0 : index
    %c0_20 = arith.constant 0 : index
    %c0_21 = arith.constant 0 : index
    %25 = vector.load %arg6[%c0_19, %c0_20, %c0_21] : memref<1x16x512xf32, #tpu.memory_space<vmem>>, vector<1x16x512xf32>
    %26 = vector.shape_cast %25 : vector<1x16x512xf32> to vector<16x512xf32>
    %27 = vector.shape_cast %24 : vector<16x512xf32> to vector<1x16x512xf32>
    tpu.vector_store %arg6[%c0_19, %c0_20, %c0_21], %27 {strides = array<i32>} : memref<1x16x512xf32, #tpu.memory_space<vmem>>, vector<1x16x512xf32>,
    return
  }
  func.func @transform_0(%arg0: i32) -> (i32, i32, i32) {
    %c0_i32 = arith.constant 0 : i32
    %c0_i32_0 = arith.constant 0 : i32
    %c0_i32_1 = arith.constant 0 : i32
    return %arg0, %c0_i32, %c0_i32_0 : i32, i32, i32
  }
  func.func @transform_1(%arg0: i32) -> (i32, i32) {
    %c0_i32 = arith.constant 0 : i32
    %c0_i32_0 = arith.constant 0 : i32
    %c0_i32_1 = arith.constant 0 : i32
    return %c0_i32, %c0_i32_0 : i32, i32
  }
  func.func @transform_2(%arg0: i32) -> (i32, i32) {
    %c0_i32 = arith.constant 0 : i32
    %c0_i32_0 = arith.constant 0 : i32
    %c0_i32_1 = arith.constant 0 : i32
    return %c0_i32, %c0_i32_0 : i32, i32
  }
  func.func @transform_3(%arg0: i32) -> (i32, i32, i32) {
    %c0_i32 = arith.constant 0 : i32
    %c0_i32_0 = arith.constant 0 : i32
    %c0_i32_1 = arith.constant 0 : i32
    return %arg0, %c0_i32, %c0_i32_0 : i32, i32, i32
  }
  func.func @transform_4(%arg0: i32) -> (i32, i32, i32) {
    %c0_i32 = arith.constant 0 : i32
    %c0_i32_0 = arith.constant 0 : i32
    %c0_i32_1 = arith.constant 0 : i32
    return %arg0, %c0_i32, %c0_i32_0 : i32, i32, i32
  }
  func.func @transform_5(%arg0: i32) -> (i32, i32, i32) {
    %c0_i32 = arith.constant 0 : i32
    %c0_i32_0 = arith.constant 0 : i32
    %c0_i32_1 = arith.constant 0 : i32
    return %arg0, %c0_i32, %c0_i32_0 : i32, i32, i32
  }
}

</mosaic_0001>

<bundles_post_ra>
// kernel: tpu_custom_call.1
= control target key start
LH: loop header
LB: loop body
LE: loop exit
PB: predicated region body
PF: predicated region fallthrough
CT: control target
= control target key end

     0   :  { %10 = vsyncpa [#allocation4], 0  ;;  %s2492_s0 = inlined_call_operand.vmem [shape: f32[2,1,640], index: 0, kind: input, shape index: {}]   ;;  %s2493_s1 = inlined_call_operand.vmem [shape: f32[16,128], index: 1, kind: input, shape index: {}]   ;;  %s2494_s2 = inlined_call_operand.hbm [shape: f32[512,512], index: 2, kind: input, shape index: {}]   ;;  %s2495_s3 = inlined_call_operand.vmem [shape: f32[2,16,1], index: 3, kind: input, shape index: {}]   ;;  %s2496_s4 = inlined_call_operand.vmem [shape: f32[2,16,1], index: 4, kind: input, shape index: {}]   ;;  %s2497_s5 = inlined_call_operand.hbm [shape: f32[2,16,512], index: 5, kind: output, shape index: {}]  }
   0x1   :  { %11 = vsyncpa [#allocation5], 0 }
   0x2   :  { %13 = vsyncpa [#allocation5 + $0x1], 0  ;;  %s2086_s18 = smov 0   ;;  %s2088_s19 = smov 0  }
   0x3   :  { %s2090_s20 = smov 0   ;;  %s2092_s21 = smov 0  }
   0x4 LB: > { %s2107_s22 = sadd.s32 4294967295, %s2030_s21   ;;  %s1830_s23 = sadd.s32 4294967294, %s2030_s21   ;;  %s2030_s21 = sphi %s2092_s21, %s2505_s21   ;;  %s2026_s20 = sphi %s2090_s20, %s2504_s20   ;;  %s2022_s19 = sphi %s2088_s19, %s2503_s19   ;;  %s2018_s18 = sphi %s2086_s18, %s2502_s18  }
   0x5   : > { %s2111_s24 = sadd.s32 1, %s2030_s21   ;;  %s146_s25 = sadd.s32 1, %s2026_s20 }
   0x6   : > { %s143_s26 = ssub.s32 %s2030_s21, %s2111_s24  ;;  %p156_p0 = scmp.ne.s32.totalorder %s2026_s20, %s2022_s19 }
   0x7   : > { %p144_p1 = scmp.eq.s32.totalorder %s143_s26, 0  ;;  %p157_p2 = scmp.eq.s32.totalorder %s2107_s22, 1 }
   0x8   : > { %p162_p3 = scmp.ne.s32.totalorder %s2022_s19, %s2018_s18  ;;  %p163_p4 = scmp.eq.s32.totalorder %s1830_s23, 1 }
   0x9   : > { %s2122_s27 = scalar_select %p144_p1, %s2026_s20, %s146_s25  }
   0xa   : > { %p2124_p5 = por %p157_p2, %p156_p0  ;;  %p2128_p6 = por %p163_p4, %p162_p3 }
   0xb   : > { %p1831_p7 = scmp.ge.s32.totalorder %s2030_s21, 1  ;;  %p170_p8 = scmp.lt.s32.totalorder %s2030_s21, 3 }
   0xc   : > { %s2499_s29 = scalar_select %p2128_p6, 1, 0 }
   0xd   : > { %p1864_p9 = scmp.eq.s32.totalorder %s2107_s22, 0  ;;  %p2135_p10 = pnand %p1831_p7, %p170_p8 }
   0xe   : > { %s2032_s6 = smov [#allocation3]  }
   0xf   : > { %s185_s7 = sshll.u32 %s2032_s6, 4  ;;  %p1856_p11 = pneg %p2135_p10  ;;  %s186_s7 = int_to_ptr.vmem [resolvable:$true] %s185_s7 }
  0x10   : > { %s1951_s8 = scalar_lea.vmem %s186_s7, 32768  ;;  %p1959_p3 = scmp.lt.s32.totalorder %s186_s7, %s186_s7 }
  0x11   : > { %p1857_p12 = pnand %p1864_p9, %p1856_p11  ;;  %p1952_p0 = scmp.ne.s32.totalorder %s186_s7, %s1951_s8 }
  0x12   : > { %p1960_p4 = scmp.lt.s32.totalorder %s1951_s8, %s1951_s8 }
  0x13   : > { %p1942_p13 = pneg %p1857_p12 }
  0x14   : > { %p1961_p6 = por %p1960_p4, %p1959_p3 }
  0x15   : > { %p1954_p1 = pnand %p1952_p0, %p1942_p13 }
  0x17   : > { %p1955_p2 = pneg %p1954_p1 }
  0x19   : > { %p1962_p7 = pnand %p1961_p6, %p1955_p2 }
  0x1b   : > { %1965 = shalt.err (!%p1962_p7)
}
  0x1c   : > { %s2033_s9 = smov 512   ;;  %s2034_s10 = smov 32  }
  0x1d   : > { %1859 = dma.hbm_to_vmem [thread:$0]  (!%p1857_p12), %s2494_s2, 32768, %s186_s7, [#allocation4], %s2033_s9, %s2033_s9, %s2034_s10  }
  0x1e   : > { %224 = sbr.rel (%p2135_p10) target bundleno = 830 (0x33e), region = 40 }
  0x23   : > { %2009 = dma.done.wait (%p1864_p9), [#allocation4], 32768  }
  0x24   : > { %2011 = vsyncadd (%p1864_p9), [#allocation4], 4294934528  ;;  %p261_p8 = scmp.lt.s32.totalorder %s2107_s22, 1  ;;  %v549_v0 = vlaneseq  ;;  %s2035_s23 = smov 376   ;;  %v2036_v12 = vmov 0   ;;  %v2051_v56 = vmov 0.0  }
  0x25   : > { %1922 = vset.pattern.permute.xlu1 %v2036_v12  ;;  %1923 = vset.pattern.permute.xlu0 %v2036_v12  ;;  %s2037_s25 = smov 368   ;;  %s2038_s26 = smov 360  }
  0x26   : > { %s2154_s13 = scalar_select %p261_p8, %s2107_s22, 1  ;;  %v2157_v1 = vshrl.u32 %v549_v0, 7  ;;  %v2237_v14 = vand.u32 127, %v549_v0  ;;  %1212 = vmatprep.mubr.f32.mxu0 %v2051_v56  ;;  %1289 = vmatprep.mubr.f32.mxu1 %v2051_v56 }
  0x27   : > { %s2039_s30 = smov 352   ;;  %s2040_s6 = smov 344  }
  0x28   : > { %s1849_s14 = smul.u32 5, %s2154_s13  ;;  %v563_v2 = vsub.s32 3, %v2157_v1  ;;  %v555_v3 = vsub.s32 1, %v2157_v1  ;;  %v567_v4 = vsub.s32 4, %v2157_v1  ;;  %v559_v5 = vsub.s32 2, %v2157_v1  ;;  %s2041_s7 = smov 336  }
  0x29   : > { %v551_v11 = vsub.s32 0, %v2157_v1  ;;  %s2042_s8 = smov 328   ;;  %s2043_s9 = smov 320   ;;  %v1142_v15 = vadd.s32 120, %v2157_v1  ;;  %v1116_v23 = vadd.s32 112, %v2157_v1  ;;  %v1090_v31 = vadd.s32 104, %v2157_v1 }
  0x2a   : > { %s264_s17 = scalar_lea.vmem %s2492_s0, %s1849_s14  ;;  %s2044_s10 = smov 312   ;;  %v1064_v44 = vadd.s32 96, %v2157_v1  ;;  %v1038_v51 = vadd.s32 88, %v2157_v1  ;;  %vm753_vm15 = vcmp.lt.s32.totalorder %v2237_v14, %v2157_v1 }
  0x2b   : > { %v547_v6 = vld [vmem:[%s264_s17] sm:$0x1f]  ;;  %s2045_s11 = smov 304   ;;  %s2046_s12 = smov 296   ;;  %vm1143_vm0 = vcmp.lt.s32.totalorder %v2237_v14, %v1142_v15  ;;  %vm1117_vm1 = vcmp.lt.s32.totalorder %v2237_v14, %v1116_v23  ;;  %vm1091_vm2 = vcmp.lt.s32.totalorder %v2237_v14, %v1090_v31 }
  0x2c   : > { %v2167_v7 = vrot.slane %v547_v6, %v563_v2  ;;  %v2169_v8 = vrot.slane %v547_v6, %v555_v3  ;;  %v2173_v9 = vrot.slane %v547_v6, %v567_v4  ;;  %v2175_v10 = vrot.slane %v547_v6, %v559_v5  ;;  %s2047_s14 = smov 288   ;;  %s1846_s15 = sshll.u32 %s2154_s13, 4 }
  0x2d   : > { %v2180_v13 = vrot.slane %v547_v6, %v551_v11  ;;  %s2048_s16 = smov 280   ;;  %vm1065_vm3 = vcmp.lt.s32.totalorder %v2237_v14, %v1064_v44  ;;  %vm1039_vm4 = vcmp.lt.s32.totalorder %v2237_v14, %v1038_v51  ;;  %v1012_v3 = vadd.s32 80, %v2157_v1  ;;  %s1848_s17 = sshll.u32 %s2107_s22, 10 }
  0x2e   : > { %1136 = vrot.lane.b32.xlu1 %v2167_v7, %s2035_s23  ;;  %1128 = vrot.lane.b32.xlu0 %v2169_v8, %s2035_s23  ;;  %v986_v11 = vadd.s32 72, %v2157_v1 }
  0x2f   : > { %vm1013_vm5 = vcmp.lt.s32.totalorder %v2237_v14, %v1012_v3  ;;  %v856_v3 = vadd.s32 32, %v2157_v1 }
  0x30   : > { %vm987_vm6 = vcmp.lt.s32.totalorder %v2237_v14, %v986_v11 }
  0x31   : > { %vm857_vm11 = vcmp.lt.s32.totalorder %v2237_v14, %v856_v3  ;;  %v329_v3 = vld [vmem:[#allocation3 + $0x1a0] sm:$0xff] }
  0x32   : > { %1140 = vrot.lane.b32.xlu1 %v2173_v9, %s2035_s23  ;;  %1132 = vrot.lane.b32.xlu0 %v2175_v10, %s2035_s23 }
  0x36   : > { %1102 = vrot.lane.b32.xlu1 %v2169_v8, %s2037_s25  ;;  %1124 = vrot.lane.b32.xlu0 %v2180_v13, %s2035_s23 }
  0x3a   : > { %1110 = vrot.lane.b32.xlu1 %v2167_v7, %s2037_s25  ;;  %1106 = vrot.lane.b32.xlu0 %v2175_v10, %s2037_s25 }
  0x3e   : > { %1098 = vrot.lane.b32.xlu1 %v2180_v13, %s2037_s25  ;;  %1114 = vrot.lane.b32.xlu0 %v2173_v9, %s2037_s25  ;;  %s2258_s25 = scalar_lea.vmem %s2495_s3, %s1846_s15 }
  0x3f   : > { %v533_v27 = vld [vmem:[%s2258_s25] sm:$0xff]  ;;  %v534_v63 = vld [vmem:[%s2258_s25 + $0x8] sm:$0xff] }
  0x42   : > { %1080 = vrot.lane.b32.xlu1 %v2175_v10, %s2038_s26  ;;  %1076 = vrot.lane.b32.xlu0 %v2169_v8, %s2038_s26 }
  0x46   : > { %1088 = vrot.lane.b32.xlu1 %v2173_v9, %s2038_s26  ;;  %1084 = vrot.lane.b32.xlu0 %v2167_v7, %s2038_s26 }
  0x4a   : > { %1050 = vrot.lane.b32.xlu1 %v2169_v8, %s2039_s30  ;;  %1072 = vrot.lane.b32.xlu0 %v2180_v13, %s2038_s26  ;;  %s2049_s26 = smov 272  }
  0x4e   : > { %1058 = vrot.lane.b32.xlu1 %v2167_v7, %s2039_s30  ;;  %1054 = vrot.lane.b32.xlu0 %v2175_v10, %s2039_s30 }
  0x52   : > { %1046 = vrot.lane.b32.xlu1 %v2180_v13, %s2039_s30  ;;  %1062 = vrot.lane.b32.xlu0 %v2173_v9, %s2039_s30  ;;  %s2050_s30 = smov 264  }
  0x56   : > { %1028 = vrot.lane.b32.xlu1 %v2175_v10, %s2040_s6  ;;  %1024 = vrot.lane.b32.xlu0 %v2169_v8, %s2040_s6 }
  0x5a   : > { %1036 = vrot.lane.b32.xlu1 %v2173_v9, %s2040_s6  ;;  %1032 = vrot.lane.b32.xlu0 %v2167_v7, %s2040_s6 }
  0x5e   : > { %998 = vrot.lane.b32.xlu1 %v2169_v8, %s2041_s7  ;;  %1020 = vrot.lane.b32.xlu0 %v2180_v13, %s2040_s6  ;;  %s2052_s6 = smov 256  }
  0x62   : > { %1006 = vrot.lane.b32.xlu1 %v2167_v7, %s2041_s7  ;;  %1002 = vrot.lane.b32.xlu0 %v2175_v10, %s2041_s7 }
  0x66   : > { %994 = vrot.lane.b32.xlu1 %v2180_v13, %s2041_s7  ;;  %1010 = vrot.lane.b32.xlu0 %v2173_v9, %s2041_s7  ;;  %s2053_s7 = smov [#allocation6]  }
  0x6a   : > { %976 = vrot.lane.b32.xlu1 %v2175_v10, %s2042_s8  ;;  %972 = vrot.lane.b32.xlu0 %v2169_v8, %s2042_s8 }
  0x6e   : > { %984 = vrot.lane.b32.xlu1 %v2173_v9, %s2042_s8  ;;  %980 = vrot.lane.b32.xlu0 %v2167_v7, %s2042_s8 }
  0x72   : > { %946 = vrot.lane.b32.xlu1 %v2169_v8, %s2043_s9  ;;  %968 = vrot.lane.b32.xlu0 %v2180_v13, %s2042_s8  ;;  %s1970_s8 = sshll.u32 %s2053_s7, 4  ;;  %s1971_s8 = int_to_ptr.vmem [resolvable:$false] %s1970_s8 }
  0x76   : > { %954 = vrot.lane.b32.xlu1 %v2167_v7, %s2043_s9  ;;  %950 = vrot.lane.b32.xlu0 %v2175_v10, %s2043_s9 }
  0x7a   : > { %942 = vrot.lane.b32.xlu1 %v2180_v13, %s2043_s9  ;;  %958 = vrot.lane.b32.xlu0 %v2173_v9, %s2043_s9  ;;  %s2325_s9 = scalar_lea.vmem %s2496_s4, %s1846_s15 }
  0x7b   : > { %v1619_v6 = vld [vmem:[%s2325_s9 + $0x8] sm:$0xff] }
  0x7e   : > { %924 = vrot.lane.b32.xlu1 %v2175_v10, %s2044_s10  ;;  %920 = vrot.lane.b32.xlu0 %v2169_v8, %s2044_s10 }
  0x82   : > { %932 = vrot.lane.b32.xlu1 %v2173_v9, %s2044_s10  ;;  %928 = vrot.lane.b32.xlu0 %v2167_v7, %s2044_s10 }
  0x86   : > { %894 = vrot.lane.b32.xlu1 %v2169_v8, %s2045_s11  ;;  %916 = vrot.lane.b32.xlu0 %v2180_v13, %s2044_s10 }
  0x8a   : > { %902 = vrot.lane.b32.xlu1 %v2167_v7, %s2045_s11  ;;  %898 = vrot.lane.b32.xlu0 %v2175_v10, %s2045_s11 }
  0x8e   : > { %890 = vrot.lane.b32.xlu1 %v2180_v13, %s2045_s11  ;;  %906 = vrot.lane.b32.xlu0 %v2173_v9, %s2045_s11 }
  0x92   : > { %872 = vrot.lane.b32.xlu1 %v2175_v10, %s2046_s12  ;;  %868 = vrot.lane.b32.xlu0 %v2169_v8, %s2046_s12 }
  0x96   : > { %880 = vrot.lane.b32.xlu1 %v2173_v9, %s2046_s12  ;;  %876 = vrot.lane.b32.xlu0 %v2167_v7, %s2046_s12 }
  0x9a   : > { %842 = vrot.lane.b32.xlu1 %v2169_v8, %s2047_s14  ;;  %864 = vrot.lane.b32.xlu0 %v2180_v13, %s2046_s12 }
  0x9e   : > { %850 = vrot.lane.b32.xlu1 %v2167_v7, %s2047_s14  ;;  %846 = vrot.lane.b32.xlu0 %v2175_v10, %s2047_s14 }
  0xa0   : > { %v1137_v16 = vpop.permute.xlu1 %1136  ;;  %v1129_v17 = vpop.permute.xlu0 %1128 }
  0xa2   : > { %838 = vrot.lane.b32.xlu1 %v2180_v13, %s2047_s14  ;;  %854 = vrot.lane.b32.xlu0 %v2173_v9, %s2047_s14  ;;  %s258_s14 = sand.u32 1, %s2022_s19  }
  0xa3   : > { %s1836_s15 = sshll.u32 %s258_s14, 6  ;;  %s2452_s22 = scalar_lea.sflag [#allocation5], %s258_s14 }
  0xa4   : > { %v1141_v18 = vpop.permute.xlu1 %1140  ;;  %v1133_v19 = vpop.permute.xlu0 %1132 }
  0xa5   : > { %v1144_v20 = vsel %vm1143_vm0, %v1137_v16, %v1141_v18  ;;  %v1145_v21 = vsel %vm1143_vm0, %v1133_v19, %v1137_v16  ;;  %v1146_v22 = vsel %vm1143_vm0, %v1129_v17, %v1133_v19 }
  0xa6   : > { %1225 = vmatprep.subr.mxu1 %v1144_v20  ;;  %820 = vrot.lane.b32.xlu1 %v2175_v10, %s2048_s16 }
  0xa7   : > { %816 = vrot.lane.b32.xlu0 %v2169_v8, %s2048_s16  ;;  %1226 = vmatpush1.msra.mxu1 %v1145_v21 }
  0xa8   : > { %v1103_v24 = vpop.permute.xlu1 %1102  ;;  %1148 = vmatprep.subr.mxu0 %v1146_v22  ;;  %v1125_v25 = vpop.permute.xlu0 %1124 }
  0xa9   : > { %v1147_v26 = vsel %vm1143_vm0, %v1125_v25, %v1129_v17  ;;  %v960_v25 = vadd.s32 64, %v2157_v1 }
  0xaa   : > { %828 = vrot.lane.b32.xlu1 %v2173_v9, %s2048_s16  ;;  %1149 = vmatpush1.msra.mxu0 %v1147_v26 }
  0xab   : > { %824 = vrot.lane.b32.xlu0 %v2167_v7, %s2048_s16  ;;  %vm961_vm7 = vcmp.lt.s32.totalorder %v2237_v14, %v960_v25 }
  0xac   : > { %v1111_v28 = vpop.permute.xlu1 %1110  ;;  %v1107_v29 = vpop.permute.xlu0 %1106 }
  0xad   : > { %v1120_v30 = vsel %vm1117_vm1, %v1103_v24, %v1107_v29  ;;  %v1119_v36 = vsel %vm1117_vm1, %v1107_v29, %v1111_v28 }
  0xae   : > { %1150 = vmatprep.subr.mxu0 %v1120_v30  ;;  %537 = vperm.xlu1 %1922, %v533_v27  }
  0xaf   : > { %812 = vrot.lane.b32.xlu0 %v2180_v13, %s2048_s16  ;;  %s2427_s16 = scalar_lea.vmem [#allocation6], %s1836_s15 }
  0xb0   : > { %v1099_v32 = vpop.permute.xlu1 %1098  ;;  %v1115_v33 = vpop.permute.xlu0 %1114  ;;  %s1732_s23 = sshll.u32 %s2427_s16, 4  ;;  %s2447_s23 = int_to_ptr.vmem [resolvable:$true] %s1732_s23 }
  0xb1   : > { %v1121_v34 = vsel %vm1117_vm1, %v1099_v32, %v1103_v24  ;;  %v1118_v35 = vsel %vm1117_vm1, %v1111_v28, %v1115_v33  ;;  %v934_v32 = vadd.s32 56, %v2157_v1  ;;  %p1973_p11 = scmp.lt.s32.totalorder %s2447_s23, %s1971_s8 }
  0xb2   : > { %1151 = vmatpush1.msra.mxu0 %v1121_v34  ;;  %1227 = vmatprep.subr.mxu1 %v1118_v35 }
  0xb3   : > { %790 = vrot.lane.b32.xlu0 %v2169_v8, %s2049_s26  ;;  %794 = vrot.lane.b32.xlu1 %v2175_v10, %s2049_s26  ;;  %vm935_vm8 = vcmp.lt.s32.totalorder %v2237_v14, %v934_v32 }
  0xb4   : > { %1228 = vmatpush1.msra.mxu1 %v1119_v36  ;;  %v1081_v37 = vpop.permute.xlu1 %1080  ;;  %v1077_v38 = vpop.permute.xlu0 %1076 }
  0xb5   : > { %v1094_v39 = vsel %vm1091_vm2, %v1077_v38, %v1081_v37 }
  0xb6   : > { %1152 = vmatprep.subr.mxu0 %v1094_v39 }
  0xb7   : > { %798 = vrot.lane.b32.xlu0 %v2167_v7, %s2049_s26  ;;  %802 = vrot.lane.b32.xlu1 %v2173_v9, %s2049_s26 }
  0xb8   : > { %v1089_v40 = vpop.permute.xlu1 %1088  ;;  %v1085_v41 = vpop.permute.xlu0 %1084 }
  0xb9   : > { %v1092_v42 = vsel %vm1091_vm2, %v1085_v41, %v1089_v40  ;;  %v1093_v43 = vsel %vm1091_vm2, %v1081_v37, %v1085_v41 }
  0xba   : > { %1229 = vmatprep.subr.mxu1 %v1092_v42 }
  0xbb   : > { %786 = vrot.lane.b32.xlu0 %v2180_v13, %s2049_s26  ;;  %764 = vrot.lane.b32.xlu1 %v2169_v8, %s2050_s30 }
  0xbc   : > { %1230 = vmatpush1.msra.mxu1 %v1093_v43  ;;  %v1051_v45 = vpop.permute.xlu1 %1050  ;;  %v1073_v46 = vpop.permute.xlu0 %1072 }
  0xbd   : > { %v1095_v47 = vsel %vm1091_vm2, %v1073_v46, %v1077_v38 }
  0xbe   : > { %1153 = vmatpush1.msra.mxu0 %v1095_v47 }
  0xbf   : > { %768 = vrot.lane.b32.xlu0 %v2175_v10, %s2050_s30  ;;  %772 = vrot.lane.b32.xlu1 %v2167_v7, %s2050_s30 }
  0xc0   : > { %v1059_v48 = vpop.permute.xlu1 %1058  ;;  %v1055_v49 = vpop.permute.xlu0 %1054 }
  0xc1   : > { %v1068_v50 = vsel %vm1065_vm3, %v1051_v45, %v1055_v49  ;;  %v1067_v57 = vsel %vm1065_vm3, %v1055_v49, %v1059_v48 }
  0xc2   : > { %1154 = vmatprep.subr.mxu0 %v1068_v50 }
  0xc3   : > { %776 = vrot.lane.b32.xlu0 %v2173_v9, %s2050_s30  ;;  %760 = vrot.lane.b32.xlu1 %v2180_v13, %s2050_s30  ;;  %s2445_s30 = scalar_lea.hbm %s2497_s5, %s1848_s17 }
  0xc4   : > { %v1047_v52 = vpop.permute.xlu1 %1046  ;;  %v1063_v53 = vpop.permute.xlu0 %1062 }
  0xc5   : > { %v1069_v54 = vsel %vm1065_vm3, %v1047_v52, %v1051_v45  ;;  %v1066_v55 = vsel %vm1065_vm3, %v1059_v48, %v1063_v53  ;;  %v908_v45 = vadd.s32 48, %v2157_v1  ;;  %v882_v52 = vadd.s32 40, %v2157_v1 }
  0xc6   : > { %1155 = vmatpush1.msra.mxu0 %v1069_v54  ;;  %1231 = vmatprep.subr.mxu1 %v1066_v55 }
  0xc7   : > { %738 = vrot.lane.b32.xlu0 %v2169_v8, %s2052_s6  ;;  %741 = vrot.lane.b32.xlu1 %v2175_v10, %s2052_s6  ;;  %vm909_vm9 = vcmp.lt.s32.totalorder %v2237_v14, %v908_v45  ;;  %vm883_vm10 = vcmp.lt.s32.totalorder %v2237_v14, %v882_v52 }
  0xc8   : > { %1232 = vmatpush1.msra.mxu1 %v1067_v57  ;;  %v1029_v58 = vpop.permute.xlu1 %1028  ;;  %v1025_v59 = vpop.permute.xlu0 %1024 }
  0xc9   : > { %v1042_v60 = vsel %vm1039_vm4, %v1025_v59, %v1029_v58 }
  0xca   : > { %1156 = vmatprep.subr.mxu0 %v1042_v60 }
  0xcb   : > { %744 = vrot.lane.b32.xlu0 %v2167_v7, %s2052_s6  ;;  %747 = vrot.lane.b32.xlu1 %v2173_v9, %s2052_s6 }
  0xcc   : > { %v1037_v61 = vpop.permute.xlu1 %1036  ;;  %v1033_v62 = vpop.permute.xlu0 %1032 }
  0xcd   : > { %v1040_v0 = vsel %vm1039_vm4, %v1033_v62, %v1037_v61  ;;  %v1041_v2 = vsel %vm1039_vm4, %v1029_v58, %v1033_v62 }
  0xce   : > { %1233 = vmatprep.subr.mxu1 %v1040_v0 }
  0xcf   : > { %735 = vrot.lane.b32.xlu0 %v2180_v13, %s2052_s6  ;;  %542 = vperm.xlu1 %1922, %v534_v63   ;;  %s1966_s6 = scalar_lea.vmem %s2447_s23, 1024 }
  0xd0   : > { %1234 = vmatpush1.msra.mxu1 %v1041_v2  ;;  %v999_v4 = vpop.permute.xlu1 %998  ;;  %v1021_v5 = vpop.permute.xlu0 %1020  ;;  %p1967_p6 = scmp.ne.s32.totalorder %s2447_s23, %s1966_s6 }
  0xd1   : > { %v1043_v7 = vsel %vm1039_vm4, %v1021_v5, %v1025_v59 }
  0xd2   : > { %1157 = vmatpush1.msra.mxu0 %v1043_v7  ;;  %p1968_p9 = pnand %p1967_p6, %p2124_p5 }
  0xd3   : > { %1627 = vperm.xlu1 %1922, %v1619_v6  }
  0xd4   : > { %v1007_v8 = vpop.permute.xlu1 %1006  ;;  %v1003_v9 = vpop.permute.xlu0 %1002  ;;  %p1969_p10 = pneg %p1968_p9 }
  0xd5   : > { %v1016_v10 = vsel %vm1013_vm5, %v999_v4, %v1003_v9  ;;  %v1015_v17 = vsel %vm1013_vm5, %v1003_v9, %v1007_v8 }
  0xd6   : > { %1158 = vmatprep.subr.mxu0 %v1016_v10  ;;  %v830_v10 = vadd.s32 24, %v2157_v1 }
  0xd8   : > { %v995_v12 = vpop.permute.xlu1 %994  ;;  %v1011_v13 = vpop.permute.xlu0 %1010  ;;  %vm831_vm12 = vcmp.lt.s32.totalorder %v2237_v14, %v830_v10  ;;  %v458_v10 = vld [vmem:[#allocation3 + $0x5a8] sm:$0xff] }
  0xd9   : > { %v1017_v15 = vsel %vm1013_vm5, %v995_v12, %v999_v4  ;;  %v1014_v16 = vsel %vm1013_vm5, %v1007_v8, %v1011_v13 }
  0xda   : > { %1159 = vmatpush1.msra.mxu0 %v1017_v15  ;;  %1235 = vmatprep.subr.mxu1 %v1014_v16 }
  0xdb   : > { %1236 = vmatpush1.msra.mxu1 %v1015_v17 }
  0xdc   : > { %v977_v18 = vpop.permute.xlu1 %976  ;;  %v973_v19 = vpop.permute.xlu0 %972 }
  0xdd   : > { %v990_v20 = vsel %vm987_vm6, %v973_v19, %v977_v18 }
  0xde   : > { %1160 = vmatprep.subr.mxu0 %v990_v20 }
  0xe0   : > { %v985_v21 = vpop.permute.xlu1 %984  ;;  %v981_v22 = vpop.permute.xlu0 %980 }
  0xe1   : > { %v988_v23 = vsel %vm987_vm6, %v981_v22, %v985_v21  ;;  %v989_v24 = vsel %vm987_vm6, %v977_v18, %v981_v22 }
  0xe2   : > { %1237 = vmatprep.subr.mxu1 %v988_v23 }
  0xe3   : > { %1238 = vmatpush1.msra.mxu1 %v989_v24 }
  0xe4   : > { %v947_v26 = vpop.permute.xlu1 %946  ;;  %v969_v27 = vpop.permute.xlu0 %968 }
  0xe5   : > { %v991_v28 = vsel %vm987_vm6, %v969_v27, %v973_v19  ;;  %v804_v27 = vadd.s32 16, %v2157_v1 }
  0xe6   : > { %1161 = vmatpush1.msra.mxu0 %v991_v28 }
  0xe7   : > { %vm805_vm13 = vcmp.lt.s32.totalorder %v2237_v14, %v804_v27  ;;  %v305_v27 = vld [vmem:[#allocation3 + $0xe0] sm:$0xff] }
  0xe8   : > { %v955_v29 = vpop.permute.xlu1 %954  ;;  %v951_v30 = vpop.permute.xlu0 %950 }
  0xe9   : > { %v964_v31 = vsel %vm961_vm7, %v947_v26, %v951_v30  ;;  %v963_v37 = vsel %vm961_vm7, %v951_v30, %v955_v29 }
  0xea   : > { %1162 = vmatprep.subr.mxu0 %v964_v31 }
  0xec   : > { %v943_v33 = vpop.permute.xlu1 %942  ;;  %v959_v34 = vpop.permute.xlu0 %958 }
  0xed   : > { %v965_v35 = vsel %vm961_vm7, %v943_v33, %v947_v26  ;;  %v962_v36 = vsel %vm961_vm7, %v955_v29, %v959_v34  ;;  %v778_v34 = vadd.s32 8, %v2157_v1 }
  0xee   : > { %1163 = vmatpush1.msra.mxu0 %v965_v35  ;;  %1239 = vmatprep.subr.mxu1 %v962_v36 }
  0xef   : > { %1240 = vmatpush1.msra.mxu1 %v963_v37  ;;  %vm779_vm14 = vcmp.lt.s32.totalorder %v2237_v14, %v778_v34  ;;  %v325_v14 = vld [vmem:[#allocation3 + $0x180] sm:$0xff]  ;;  %v434_v34 = vld [vmem:[#allocation3 + $0x4e8] sm:$0xff] }
  0xf0   : > { %v925_v38 = vpop.permute.xlu1 %924  ;;  %v921_v39 = vpop.permute.xlu0 %920 }
  0xf1   : > { %v938_v40 = vsel %vm935_vm8, %v921_v39, %v925_v38 }
  0xf2   : > { %1164 = vmatprep.subr.mxu0 %v938_v40 }
  0xf4   : > { %v933_v41 = vpop.permute.xlu1 %932  ;;  %v929_v42 = vpop.permute.xlu0 %928 }
  0xf5   : > { %v936_v43 = vsel %vm935_vm8, %v929_v42, %v933_v41  ;;  %v937_v44 = vsel %vm935_vm8, %v925_v38, %v929_v42 }
  0xf6   : > { %1241 = vmatprep.subr.mxu1 %v936_v43 }
  0xf7   : > { %1242 = vmatpush1.msra.mxu1 %v937_v44 }
  0xf8   : > { %v895_v46 = vpop.permute.xlu1 %894  ;;  %v917_v47 = vpop.permute.xlu0 %916 }
  0xf9   : > { %v939_v48 = vsel %vm935_vm8, %v917_v47, %v921_v39 }
  0xfa   : > { %1165 = vmatpush1.msra.mxu0 %v939_v48 }
  0xfc   : > { %v903_v49 = vpop.permute.xlu1 %902  ;;  %v899_v50 = vpop.permute.xlu0 %898 }
  0xfd   : > { %v912_v51 = vsel %vm909_vm9, %v895_v46, %v899_v50  ;;  %v911_v58 = vsel %vm909_vm9, %v899_v50, %v903_v49 }
  0xfe   : > { %1166 = vmatprep.subr.mxu0 %v912_v51 }
 0x100   : > { %v891_v53 = vpop.permute.xlu1 %890  ;;  %v907_v54 = vpop.permute.xlu0 %906 }
 0x101   : > { %v913_v55 = vsel %vm909_vm9, %v891_v53, %v895_v46  ;;  %v910_v57 = vsel %vm909_vm9, %v903_v49, %v907_v54  ;;  %v275_v49 = vld [vmem:[%s2493_s1] sm:$0xff]  ;;  %v338_v53 = vld [vmem:[#allocation3 + $0x1e8] sm:$0xff] }
 0x102   : > { %1167 = vmatpush1.msra.mxu0 %v913_v55  ;;  %1243 = vmatprep.subr.mxu1 %v910_v57  ;;  %v337_v57 = vld [vmem:[#allocation3 + $0x1e0] sm:$0xff] }
 0x103   : > { %1244 = vmatpush1.msra.mxu1 %v911_v58  ;;  %v334_v58 = vld [vmem:[#allocation3 + $0x1c8] sm:$0xff] }
 0x104   : > { %v873_v59 = vpop.permute.xlu1 %872  ;;  %v869_v60 = vpop.permute.xlu0 %868 }
 0x105   : > { %v886_v61 = vsel %vm883_vm10, %v869_v60, %v873_v59 }
 0x106   : > { %1168 = vmatprep.subr.mxu0 %v886_v61 }
 0x108   : > { %v881_v62 = vpop.permute.xlu1 %880  ;;  %v877_v63 = vpop.permute.xlu0 %876 }
 0x109   : > { %v884_v0 = vsel %vm883_vm10, %v877_v63, %v881_v62  ;;  %v885_v2 = vsel %vm883_vm10, %v873_v59, %v877_v63  ;;  %v330_v62 = vld [vmem:[#allocation3 + $0x1a8] sm:$0xff] }
 0x10a   : > { %1245 = vmatprep.subr.mxu1 %v884_v0  ;;  %v466_v0 = vld [vmem:[#allocation3 + $0x5e8] sm:$0xff] }
 0x10b   : > { %1246 = vmatpush1.msra.mxu1 %v885_v2  ;;  %v276_v2 = vld [vmem:[%s2493_s1 + $0x8] sm:$0xff] }
 0x10c   : > { %v843_v4 = vpop.permute.xlu1 %842  ;;  %v865_v5 = vpop.permute.xlu0 %864 }
 0x10d   : > { %v887_v6 = vsel %vm883_vm10, %v865_v5, %v869_v60  ;;  %v333_v60 = vld [vmem:[#allocation3 + $0x1c0] sm:$0xff]  ;;  %v326_v5 = vld [vmem:[#allocation3 + $0x188] sm:$0xff] }
 0x10e   : > { %1169 = vmatpush1.msra.mxu0 %v887_v6  ;;  %v462_v6 = vld [vmem:[#allocation3 + $0x5c8] sm:$0xff] }
 0x110   : > { %v851_v7 = vpop.permute.xlu1 %850  ;;  %v847_v8 = vpop.permute.xlu0 %846 }
 0x111   : > { %v860_v9 = vsel %vm857_vm11, %v843_v4, %v847_v8  ;;  %v859_v16 = vsel %vm857_vm11, %v847_v8, %v851_v7  ;;  %v461_v8 = vld [vmem:[#allocation3 + $0x5c0] sm:$0xff] }
 0x112   : > { %1170 = vmatprep.subr.mxu0 %v860_v9  ;;  %v322_v9 = vld [vmem:[#allocation3 + $0x168] sm:$0xff] }
 0x114   : > { %v839_v11 = vpop.permute.xlu1 %838  ;;  %v855_v12 = vpop.permute.xlu0 %854 }
 0x115   : > { %v861_v13 = vsel %vm857_vm11, %v839_v11, %v843_v4  ;;  %v858_v15 = vsel %vm857_vm11, %v851_v7, %v855_v12  ;;  %v465_v4 = vld [vmem:[#allocation3 + $0x5e0] sm:$0xff] }
 0x116   : > { %1171 = vmatpush1.msra.mxu0 %v861_v13  ;;  %1247 = vmatprep.subr.mxu1 %v858_v15  ;;  %v321_v11 = vld [vmem:[#allocation3 + $0x160] sm:$0xff]  ;;  %v318_v13 = vld [vmem:[#allocation3 + $0x148] sm:$0xff] }
 0x117   : > { %1248 = vmatpush1.msra.mxu1 %v859_v16  ;;  %v457_v12 = vld [vmem:[#allocation3 + $0x5a0] sm:$0xff]  ;;  %v454_v15 = vld [vmem:[#allocation3 + $0x588] sm:$0xff] }
 0x118   : > { %v821_v17 = vpop.permute.xlu1 %820  ;;  %v453_v16 = vld [vmem:[#allocation3 + $0x580] sm:$0xff] }
 0x119   : > { %v817_v18 = vpop.permute.xlu0 %816 }
 0x11a   : > { %v834_v19 = vsel %vm831_vm12, %v817_v18, %v821_v17 }
 0x11b   : > { %1172 = vmatprep.subr.mxu0 %v834_v19  ;;  %v313_v19 = vld [vmem:[#allocation3 + $0x120] sm:$0xff] }
 0x11c   : > { %v829_v20 = vpop.permute.xlu1 %828 }
 0x11d   : > { %v825_v21 = vpop.permute.xlu0 %824 }
 0x11e   : > { %v832_v22 = vsel %vm831_vm12, %v825_v21, %v829_v20  ;;  %v833_v23 = vsel %vm831_vm12, %v821_v17, %v825_v21  ;;  %v314_v17 = vld [vmem:[#allocation3 + $0x128] sm:$0xff]  ;;  %v449_v20 = vld [vmem:[#allocation3 + $0x560] sm:$0xff] }
 0x11f   : > { %1249 = vmatprep.subr.mxu1 %v832_v22  ;;  %v310_v21 = vld [vmem:[#allocation3 + $0x108] sm:$0xff] }
 0x120   : > { %1250 = vmatpush1.msra.mxu1 %v833_v23  ;;  %v446_v22 = vld [vmem:[#allocation3 + $0x548] sm:$0xff]  ;;  %v309_v23 = vld [vmem:[#allocation3 + $0x100] sm:$0xff] }
 0x121   : > { %v813_v24 = vpop.permute.xlu0 %812 }
 0x122   : > { %v835_v25 = vsel %vm831_vm12, %v813_v24, %v817_v18  ;;  %v450_v18 = vld [vmem:[#allocation3 + $0x568] sm:$0xff]  ;;  %v445_v24 = vld [vmem:[#allocation3 + $0x540] sm:$0xff] }
 0x123   : > { %1173 = vmatpush1.msra.mxu0 %v835_v25  ;;  %v306_v25 = vld [vmem:[#allocation3 + $0xe8] sm:$0xff] }
 0x125   : > { %v791_v26 = vpop.permute.xlu0 %790 }
 0x129   : > { %v799_v28 = vpop.permute.xlu0 %798  ;;  %v538_v29 = vpop.permute.xlu1 %537 }
 0x12a   : > { %v545_v54 = vmul.f32 %v538_v29, %v275_v49  ;;  %v302_v29 = vld [vmem:[#allocation3 + $0xc8] sm:$0xff] }
 0x12b   : > { %v282_v49 = vld [vmem:[#allocation3 + $0x28] sm:$0xff] }
 0x12d   : > { %v787_v30 = vpop.permute.xlu0 %786  ;;  %v795_v31 = vpop.permute.xlu1 %794 }
 0x12e   : > { %v808_v32 = vsel %vm805_vm13, %v791_v26, %v795_v31  ;;  %v809_v33 = vsel %vm805_vm13, %v787_v30, %v791_v26  ;;  %v807_v38 = vsel %vm805_vm13, %v795_v31, %v799_v28  ;;  %v442_v26 = vld [vmem:[#allocation3 + $0x528] sm:$0xff]  ;;  %v301_v31 = vld [vmem:[#allocation3 + $0xc0] sm:$0xff] }
 0x12f   : > { %1174 = vmatprep.subr.mxu0 %v808_v32  ;;  %v438_v30 = vld [vmem:[#allocation3 + $0x508] sm:$0xff]  ;;  %v437_v32 = vld [vmem:[#allocation3 + $0x500] sm:$0xff] }
 0x130   : > { %1175 = vmatpush1.msra.mxu0 %v809_v33  ;;  %v298_v33 = vld [vmem:[#allocation3 + $0xa8] sm:$0xff] }
 0x131   : > { %v769_v35 = vpop.permute.xlu0 %768  ;;  %v803_v36 = vpop.permute.xlu1 %802 }
 0x132   : > { %v806_v37 = vsel %vm805_vm13, %v799_v28, %v803_v36  ;;  %v441_v28 = vld [vmem:[#allocation3 + $0x520] sm:$0xff] }
 0x133   : > { %1251 = vmatprep.subr.mxu1 %v806_v37  ;;  %v433_v36 = vld [vmem:[#allocation3 + $0x4e0] sm:$0xff]  ;;  %v294_v37 = vld [vmem:[#allocation3 + $0x88] sm:$0xff] }
 0x134   : > { %1252 = vmatpush1.msra.mxu1 %v807_v38  ;;  %v430_v38 = vld [vmem:[#allocation3 + $0x4c8] sm:$0xff] }
 0x135   : > { %v777_v39 = vpop.permute.xlu0 %776  ;;  %v765_v40 = vpop.permute.xlu1 %764 }
 0x136   : > { %v782_v41 = vsel %vm779_vm14, %v765_v40, %v769_v35 }
 0x137   : > { %1176 = vmatprep.subr.mxu0 %v782_v41  ;;  %v290_v41 = vld [vmem:[#allocation3 + $0x68] sm:$0xff] }
 0x139   : > { %v739_v42 = vpop.permute.xlu0 %738  ;;  %v773_v43 = vpop.permute.xlu1 %772 }
 0x13a   : > { %v780_v44 = vsel %vm779_vm14, %v773_v43, %v777_v39  ;;  %v781_v45 = vsel %vm779_vm14, %v769_v35, %v773_v43  ;;  %v297_v35 = vld [vmem:[#allocation3 + $0xa0] sm:$0xff] }
 0x13b   : > { %1253 = vmatprep.subr.mxu1 %v780_v44  ;;  %v293_v39 = vld [vmem:[#allocation3 + $0x80] sm:$0xff] }
 0x13c   : > { %1254 = vmatpush1.msra.mxu1 %v781_v45  ;;  %v289_v43 = vld [vmem:[#allocation3 + $0x60] sm:$0xff]  ;;  %v286_v45 = vld [vmem:[#allocation3 + $0x48] sm:$0xff] }
 0x13d   : > { %v745_v46 = vpop.permute.xlu0 %744  ;;  %v761_v47 = vpop.permute.xlu1 %760  ;;  %v425_v44 = vld [vmem:[#allocation3 + $0x4a0] sm:$0xff] }
 0x13e   : > { %v783_v48 = vsel %vm779_vm14, %v761_v47, %v765_v40  ;;  %v429_v40 = vld [vmem:[#allocation3 + $0x4c0] sm:$0xff] }
 0x13f   : > { %1177 = vmatpush1.msra.mxu0 %v783_v48  ;;  %v285_v47 = vld [vmem:[#allocation3 + $0x40] sm:$0xff] }
 0x140   : > { %v421_v48 = vld [vmem:[#allocation3 + $0x480] sm:$0xff] }
 0x141   : > { %v736_v50 = vpop.permute.xlu0 %735  ;;  %v742_v51 = vpop.permute.xlu1 %741 }
 0x142   : > { %v756_v52 = vsel %vm753_vm15, %v739_v42, %v742_v51  ;;  %v757_v55 = vsel %vm753_vm15, %v736_v50, %v739_v42  ;;  %v755_v63 = vsel %vm753_vm15, %v742_v51, %v745_v46  ;;  %v426_v42 = vld [vmem:[#allocation3 + $0x4a8] sm:$0xff]  ;;  %v281_v51 = vld [vmem:[#allocation3 + $0x20] sm:$0xff] }
 0x143   : > { %1178 = vmatprep.subr.mxu0 %v756_v52  ;;  %v418_v50 = vld [vmem:[#allocation3 + $0x468] sm:$0xff]  ;;  %v417_v52 = vld [vmem:[#allocation3 + $0x460] sm:$0xff] }
 0x144   : > { %1179 = vmatpush1.msra.mxu0 %v757_v55  ;;  %v277_v55 = vld [vmem:[#allocation3] sm:$0xff] }
 0x145   : > { %v748_v59 = vpop.permute.xlu1 %747  ;;  %1213 = vmatmul.mubr.f32.vlgmr.msra.gmra.mxu0 %v545_v54  ;;  %1310 = vmatprep.subr.mxu0 %v338_v53  ;;  %v278_v53 = vld [vmem:[#allocation3 + $0x8] sm:$0xff] }
 0x146   : > { %v754_v61 = vsel %vm753_vm15, %v745_v46, %v748_v59  ;;  %1218 = vmatprep.mubr.f32.mxu0 %v2051_v56  ;;  %1311 = vmatpush1.msra.mxu0 %v337_v57  ;;  %v422_v46 = vld [vmem:[#allocation3 + $0x488] sm:$0xff]  ;;  %v413_v57 = vld [vmem:[#allocation3 + $0x440] sm:$0xff] }
 0x147   : > { %1255 = vmatprep.subr.mxu1 %v754_v61  ;;  %1312 = vmatprep.subr.mxu0 %v334_v58  ;;  %v402_v58 = vld [vmem:[#allocation3 + $0x3e8] sm:$0xff]  ;;  %v409_v61 = vld [vmem:[#allocation3 + $0x420] sm:$0xff] }
 0x148   : > { %1256 = vmatpush1.msra.mxu1 %v755_v63  ;;  %1313 = vmatpush1.msra.mxu0 %v333_v60  ;;  %v410_v59 = vld [vmem:[#allocation3 + $0x428] sm:$0xff]  ;;  %v401_v60 = vld [vmem:[#allocation3 + $0x3e0] sm:$0xff] }
 0x149   : > { %1290 = vmatmul.mubr.f32.vlgmr.msra.gmra.mxu1 %v545_v54  ;;  %1314 = vmatprep.subr.mxu0 %v330_v62  ;;  %v414_v54 = vld [vmem:[#allocation3 + $0x448] sm:$0xff] }
 0x14a   : > { %v543_v7 = vpop.permute.xlu1 %542  ;;  %1295 = vmatprep.mubr.f32.mxu1 %v2051_v56  ;;  %1387 = vmatprep.subr.mxu1 %v466_v0  ;;  %v317_v56 = vld [vmem:[#allocation3 + $0x140] sm:$0xff]  ;;  %v398_v62 = vld [vmem:[#allocation3 + $0x3c8] sm:$0xff] }
 0x14b   : > { %v546_v1 = vmul.f32 %v543_v7, %v276_v2  ;;  %1315 = vmatpush1.msra.mxu0 %v329_v3  ;;  %1388 = vmatpush1.msra.mxu1 %v465_v4  ;;  %v406_v63 = vld [vmem:[#allocation3 + $0x408] sm:$0xff]  ;;  %v397_v0 = vld [vmem:[#allocation3 + $0x3c0] sm:$0xff] }
 0x14c   : > { %1316 = vmatprep.subr.mxu0 %v326_v5  ;;  %1389 = vmatprep.subr.mxu1 %v462_v6  ;;  %v405_v2 = vld [vmem:[#allocation3 + $0x400] sm:$0xff]  ;;  %v394_v3 = vld [vmem:[#allocation3 + $0x3a8] sm:$0xff] }
 0x14d   : > { %1219 = vmatmul.mubr.f32.gmra.mxu0 %v546_v1  ;;  %1296 = vmatmul.mubr.f32.gmra.mxu1 %v546_v1  ;;  %v530_v4 = vld [vmem:[#allocation3 + $0x7e8] sm:$0xff]  ;;  %v393_v5 = vld [vmem:[#allocation3 + $0x3a0] sm:$0xff] }
 0x14e   : > { %1317 = vmatpush1.msra.mxu0 %v325_v14  ;;  %1390 = vmatpush1.msra.mxu1 %v461_v8  ;;  %v529_v6 = vld [vmem:[#allocation3 + $0x7e0] sm:$0xff]  ;;  %v390_v7 = vld [vmem:[#allocation3 + $0x388] sm:$0xff] }
 0x14f   : > { %1318 = vmatprep.subr.mxu0 %v322_v9  ;;  %1391 = vmatprep.subr.mxu1 %v458_v10  ;;  %v526_v1 = vld [vmem:[#allocation3 + $0x7c8] sm:$0xff]  ;;  %v389_v14 = vld [vmem:[#allocation3 + $0x380] sm:$0xff] }
 0x150   : > { %1319 = vmatpush1.msra.mxu0 %v321_v11  ;;  %1392 = vmatpush1.msra.mxu1 %v457_v12  ;;  %v525_v8 = vld [vmem:[#allocation3 + $0x7c0] sm:$0xff]  ;;  %v386_v9 = vld [vmem:[#allocation3 + $0x368] sm:$0xff] }
 0x151   : > { %1320 = vmatprep.subr.mxu0 %v318_v13  ;;  %1393 = vmatprep.subr.mxu1 %v454_v15  ;;  %v522_v10 = vld [vmem:[#allocation3 + $0x7a8] sm:$0xff]  ;;  %v385_v11 = vld [vmem:[#allocation3 + $0x360] sm:$0xff] }
 0x152   : > { %1321 = vmatpush1.msra.mxu0 %v317_v56  ;;  %1394 = vmatpush1.msra.mxu1 %v453_v16  ;;  %v521_v12 = vld [vmem:[#allocation3 + $0x7a0] sm:$0xff]  ;;  %v382_v13 = vld [vmem:[#allocation3 + $0x348] sm:$0xff] }
 0x153   : > { %1322 = vmatprep.subr.mxu0 %v314_v17  ;;  %1395 = vmatprep.subr.mxu1 %v450_v18  ;;  %v518_v15 = vld [vmem:[#allocation3 + $0x788] sm:$0xff]  ;;  %v381_v56 = vld [vmem:[#allocation3 + $0x340] sm:$0xff] }
 0x154   : > { %1323 = vmatpush1.msra.mxu0 %v313_v19  ;;  %1396 = vmatpush1.msra.mxu1 %v449_v20  ;;  %v517_v16 = vld [vmem:[#allocation3 + $0x780] sm:$0xff]  ;;  %v378_v17 = vld [vmem:[#allocation3 + $0x328] sm:$0xff] }
 0x155   : > { %1324 = vmatprep.subr.mxu0 %v310_v21  ;;  %1397 = vmatprep.subr.mxu1 %v446_v22  ;;  %v514_v18 = vld [vmem:[#allocation3 + $0x768] sm:$0xff]  ;;  %v377_v19 = vld [vmem:[#allocation3 + $0x320] sm:$0xff] }
 0x156   : > { %1325 = vmatpush1.msra.mxu0 %v309_v23  ;;  %1398 = vmatpush1.msra.mxu1 %v445_v24  ;;  %v513_v20 = vld [vmem:[#allocation3 + $0x760] sm:$0xff]  ;;  %v374_v21 = vld [vmem:[#allocation3 + $0x308] sm:$0xff] }
 0x157   : > { %1326 = vmatprep.subr.mxu0 %v306_v25  ;;  %1399 = vmatprep.subr.mxu1 %v442_v26  ;;  %v510_v22 = vld [vmem:[#allocation3 + $0x748] sm:$0xff]  ;;  %v373_v23 = vld [vmem:[#allocation3 + $0x300] sm:$0xff] }
 0x158   : > { %1327 = vmatpush1.msra.mxu0 %v305_v27  ;;  %1400 = vmatpush1.msra.mxu1 %v441_v28  ;;  %v509_v24 = vld [vmem:[#allocation3 + $0x740] sm:$0xff]  ;;  %v370_v25 = vld [vmem:[#allocation3 + $0x2e8] sm:$0xff] }
 0x159   : > { %1328 = vmatprep.subr.mxu0 %v302_v29  ;;  %1401 = vmatprep.subr.mxu1 %v438_v30  ;;  %v506_v26 = vld [vmem:[#allocation3 + $0x728] sm:$0xff]  ;;  %v369_v27 = vld [vmem:[#allocation3 + $0x2e0] sm:$0xff] }
 0x15a   : > { %1329 = vmatpush1.msra.mxu0 %v301_v31  ;;  %1402 = vmatpush1.msra.mxu1 %v437_v32  ;;  %v505_v28 = vld [vmem:[#allocation3 + $0x720] sm:$0xff]  ;;  %v366_v29 = vld [vmem:[#allocation3 + $0x2c8] sm:$0xff] }
 0x15b   : > { %1330 = vmatprep.subr.mxu0 %v298_v33  ;;  %1403 = vmatprep.subr.mxu1 %v434_v34  ;;  %v502_v30 = vld [vmem:[#allocation3 + $0x708] sm:$0xff]  ;;  %v365_v31 = vld [vmem:[#allocation3 + $0x2c0] sm:$0xff] }
 0x15c   : > { %1331 = vmatpush1.msra.mxu0 %v297_v35  ;;  %1404 = vmatpush1.msra.mxu1 %v433_v36  ;;  %v501_v32 = vld [vmem:[#allocation3 + $0x700] sm:$0xff]  ;;  %v362_v33 = vld [vmem:[#allocation3 + $0x2a8] sm:$0xff] }
 0x15d   : > { %1332 = vmatprep.subr.mxu0 %v294_v37  ;;  %1405 = vmatprep.subr.mxu1 %v430_v38  ;;  %v498_v34 = vld [vmem:[#allocation3 + $0x6e8] sm:$0xff]  ;;  %v361_v35 = vld [vmem:[#allocation3 + $0x2a0] sm:$0xff] }
 0x15e   : > { %1333 = vmatpush1.msra.mxu0 %v293_v39  ;;  %1406 = vmatpush1.msra.mxu1 %v429_v40  ;;  %v497_v36 = vld [vmem:[#allocation3 + $0x6e0] sm:$0xff]  ;;  %v358_v37 = vld [vmem:[#allocation3 + $0x288] sm:$0xff] }
 0x15f   : > { %1334 = vmatprep.subr.mxu0 %v290_v41  ;;  %1407 = vmatprep.subr.mxu1 %v426_v42  ;;  %v494_v38 = vld [vmem:[#allocation3 + $0x6c8] sm:$0xff]  ;;  %v357_v39 = vld [vmem:[#allocation3 + $0x280] sm:$0xff] }
 0x160   : > { %1335 = vmatpush1.msra.mxu0 %v289_v43  ;;  %1408 = vmatpush1.msra.mxu1 %v425_v44  ;;  %v493_v40 = vld [vmem:[#allocation3 + $0x6c0] sm:$0xff]  ;;  %v354_v41 = vld [vmem:[#allocation3 + $0x268] sm:$0xff] }
 0x161   : > { %1336 = vmatprep.subr.mxu0 %v286_v45  ;;  %1409 = vmatprep.subr.mxu1 %v422_v46  ;;  %v490_v42 = vld [vmem:[#allocation3 + $0x6a8] sm:$0xff]  ;;  %v353_v43 = vld [vmem:[#allocation3 + $0x260] sm:$0xff] }
 0x162   : > { %1337 = vmatpush1.msra.mxu0 %v285_v47  ;;  %1410 = vmatpush1.msra.mxu1 %v421_v48  ;;  %v489_v44 = vld [vmem:[#allocation3 + $0x6a0] sm:$0xff]  ;;  %v350_v45 = vld [vmem:[#allocation3 + $0x248] sm:$0xff] }
 0x163   : > { %1338 = vmatprep.subr.mxu0 %v282_v49  ;;  %1411 = vmatprep.subr.mxu1 %v418_v50  ;;  %v486_v46 = vld [vmem:[#allocation3 + $0x688] sm:$0xff]  ;;  %v349_v47 = vld [vmem:[#allocation3 + $0x240] sm:$0xff] }
 0x164   : > { %1339 = vmatpush1.msra.mxu0 %v281_v51  ;;  %1412 = vmatpush1.msra.mxu1 %v417_v52  ;;  %v485_v48 = vld [vmem:[#allocation3 + $0x680] sm:$0xff]  ;;  %v346_v49 = vld [vmem:[#allocation3 + $0x228] sm:$0xff] }
 0x165   : > { %1340 = vmatprep.subr.mxu0 %v278_v53  ;;  %1413 = vmatprep.subr.mxu1 %v414_v54  ;;  %v482_v50 = vld [vmem:[#allocation3 + $0x668] sm:$0xff]  ;;  %v345_v51 = vld [vmem:[#allocation3 + $0x220] sm:$0xff] }
 0x166   : > { %1341 = vmatpush1.msra.mxu0 %v277_v55  ;;  %1414 = vmatpush1.msra.mxu1 %v413_v57  ;;  %v481_v52 = vld [vmem:[#allocation3 + $0x660] sm:$0xff]  ;;  %v342_v53 = vld [vmem:[#allocation3 + $0x208] sm:$0xff] }
 0x167   : > { %1342 = vmatprep.subr.mxu0 %v402_v58  ;;  %1415 = vmatprep.subr.mxu1 %v410_v59  ;;  %v478_v54 = vld [vmem:[#allocation3 + $0x648] sm:$0xff]  ;;  %v341_v55 = vld [vmem:[#allocation3 + $0x200] sm:$0xff]  ;;  %v340_v59 = vld [vmem:[#allocation3 + $0x1f8] sm:$0xff] }
 0x168   : > { %1343 = vmatpush2.msra.mxu0 %v401_v60  ;;  %1416 = vmatpush1.msra.mxu1 %v409_v61  ;;  %v477_v57 = vld [vmem:[#allocation3 + $0x640] sm:$0xff]  ;;  %v474_v58 = vld [vmem:[#allocation3 + $0x628] sm:$0xff] }
 0x169   : > { %1344 = vmatprep.subr.mxu0 %v398_v62  ;;  %1417 = vmatprep.subr.mxu1 %v406_v63  ;;  %v473_v60 = vld [vmem:[#allocation3 + $0x620] sm:$0xff]  ;;  %v470_v61 = vld [vmem:[#allocation3 + $0x608] sm:$0xff]  ;;  %v468_v63 = vld [vmem:[#allocation3 + $0x5f8] sm:$0xff] }
 0x16a   : > { %1345 = vmatpush2.msra.mxu0 %v397_v0  ;;  %1418 = vmatpush1.msra.mxu1 %v405_v2  ;;  %v469_v62 = vld [vmem:[#allocation3 + $0x600] sm:$0xff] }
 0x16b   : > { %1346 = vmatprep.subr.mxu0 %v394_v3  ;;  %1419 = vmatprep.subr.mxu1 %v530_v4  ;;  %v1618_v0 = vld [vmem:[%s2325_s9] sm:$0xff]  ;;  %s1972_s9 = scalar_lea.vmem %s1971_s8, 2048 }
 0x16c   : > { %1347 = vmatpush2.msra.mxu0 %v393_v5  ;;  %1420 = vmatpush2.msra.mxu1 %v529_v6  ;;  %p1974_p12 = scmp.lt.s32.totalorder %s1972_s9, %s1966_s6 }
 0x16d   : > { %1348 = vmatprep.subr.mxu0 %v390_v7  ;;  %1421 = vmatprep.subr.mxu1 %v526_v1  ;;  %v339_v7 = vld [vmem:[#allocation3 + $0x1f0] sm:$0xff]  ;;  %v336_v1 = vld [vmem:[#allocation3 + $0x1d8] sm:$0xff] }
 0x16e   : > { %1349 = vmatpush2.msra.mxu0 %v389_v14  ;;  %1422 = vmatpush2.msra.mxu1 %v525_v8  ;;  %v335_v8 = vld [vmem:[#allocation3 + $0x1d0] sm:$0xff]  ;;  %p1975_p13 = por %p1974_p12, %p1973_p11 }
 0x16f   : > { %1350 = vmatprep.subr.mxu0 %v386_v9  ;;  %1423 = vmatprep.subr.mxu1 %v522_v10  ;;  %v332_v10 = vld [vmem:[#allocation3 + $0x1b8] sm:$0xff] }
 0x170   : > { %1351 = vmatpush2.msra.mxu0 %v385_v11  ;;  %1424 = vmatpush2.msra.mxu1 %v521_v12  ;;  %p1976_p0 = pnand %p1975_p13, %p1969_p10 }
 0x171   : > { %1352 = vmatprep.subr.mxu0 %v382_v13  ;;  %1425 = vmatprep.subr.mxu1 %v518_v15  ;;  %v331_v15 = vld [vmem:[#allocation3 + $0x1b0] sm:$0xff] }
 0x172   : > { %1353 = vmatpush2.msra.mxu0 %v381_v56  ;;  %1426 = vmatpush2.msra.mxu1 %v517_v16  ;;  %v467_v56 = vld [vmem:[#allocation3 + $0x5f0] sm:$0xff]  ;;  %v328_v16 = vld [vmem:[#allocation3 + $0x198] sm:$0xff] }
 0x173   : > { %1354 = vmatprep.subr.mxu0 %v378_v17  ;;  %1427 = vmatprep.subr.mxu1 %v514_v18  ;;  %v464_v17 = vld [vmem:[#allocation3 + $0x5d8] sm:$0xff] }
 0x174   : > { %1355 = vmatpush2.msra.mxu0 %v377_v19  ;;  %1428 = vmatpush2.msra.mxu1 %v513_v20  ;;  %v327_v20 = vld [vmem:[#allocation3 + $0x190] sm:$0xff] }
 0x175   : > { %1356 = vmatprep.subr.mxu0 %v374_v21  ;;  %1429 = vmatprep.subr.mxu1 %v510_v22 }
 0x176   : > { %1357 = vmatpush2.msra.mxu0 %v373_v23  ;;  %1430 = vmatpush2.msra.mxu1 %v509_v24  ;;  %v463_v23 = vld [vmem:[#allocation3 + $0x5d0] sm:$0xff] }
 0x177   : > { %1358 = vmatprep.subr.mxu0 %v370_v25  ;;  %1431 = vmatprep.subr.mxu1 %v506_v26  ;;  %v324_v25 = vld [vmem:[#allocation3 + $0x178] sm:$0xff] }
 0x178   : > { %1359 = vmatpush2.msra.mxu0 %v369_v27  ;;  %1432 = vmatpush2.msra.mxu1 %v505_v28  ;;  %v460_v26 = vld [vmem:[#allocation3 + $0x5b8] sm:$0xff]  ;;  %v323_v28 = vld [vmem:[#allocation3 + $0x170] sm:$0xff] }
 0x179   : > { %1360 = vmatprep.subr.mxu0 %v366_v29  ;;  %1433 = vmatprep.subr.mxu1 %v502_v30  ;;  %v459_v29 = vld [vmem:[#allocation3 + $0x5b0] sm:$0xff]  ;;  %v320_v30 = vld [vmem:[#allocation3 + $0x158] sm:$0xff] }
 0x17a   : > { %1361 = vmatpush2.msra.mxu0 %v365_v31  ;;  %1434 = vmatpush2.msra.mxu1 %v501_v32  ;;  %v456_v31 = vld [vmem:[#allocation3 + $0x598] sm:$0xff]  ;;  %v319_v32 = vld [vmem:[#allocation3 + $0x150] sm:$0xff] }
 0x17b   : > { %1362 = vmatprep.subr.mxu0 %v362_v33  ;;  %1435 = vmatprep.subr.mxu1 %v498_v34  ;;  %v455_v33 = vld [vmem:[#allocation3 + $0x590] sm:$0xff]  ;;  %v316_v34 = vld [vmem:[#allocation3 + $0x138] sm:$0xff] }
 0x17c   : > { %1363 = vmatpush2.msra.mxu0 %v361_v35  ;;  %1436 = vmatpush2.msra.mxu1 %v497_v36  ;;  %v452_v35 = vld [vmem:[#allocation3 + $0x578] sm:$0xff]  ;;  %v315_v36 = vld [vmem:[#allocation3 + $0x130] sm:$0xff] }
 0x17d   : > { %1364 = vmatprep.subr.mxu0 %v358_v37  ;;  %1437 = vmatprep.subr.mxu1 %v494_v38  ;;  %v451_v37 = vld [vmem:[#allocation3 + $0x570] sm:$0xff]  ;;  %v312_v38 = vld [vmem:[#allocation3 + $0x118] sm:$0xff] }
 0x17e   : > { %1365 = vmatpush2.msra.mxu0 %v357_v39  ;;  %1438 = vmatpush2.msra.mxu1 %v493_v40  ;;  %v448_v39 = vld [vmem:[#allocation3 + $0x558] sm:$0xff]  ;;  %v311_v40 = vld [vmem:[#allocation3 + $0x110] sm:$0xff] }
 0x17f   : > { %1366 = vmatprep.subr.mxu0 %v354_v41  ;;  %1439 = vmatprep.subr.mxu1 %v490_v42  ;;  %v447_v41 = vld [vmem:[#allocation3 + $0x550] sm:$0xff]  ;;  %v308_v42 = vld [vmem:[#allocation3 + $0xf8] sm:$0xff] }
 0x180   : > { %1367 = vmatpush2.msra.mxu0 %v353_v43  ;;  %1440 = vmatpush2.msra.mxu1 %v489_v44  ;;  %v444_v43 = vld [vmem:[#allocation3 + $0x538] sm:$0xff]  ;;  %v307_v44 = vld [vmem:[#allocation3 + $0xf0] sm:$0xff] }
 0x181   : > { %1368 = vmatprep.subr.mxu0 %v350_v45  ;;  %1441 = vmatprep.subr.mxu1 %v486_v46  ;;  %v443_v45 = vld [vmem:[#allocation3 + $0x530] sm:$0xff]  ;;  %v304_v46 = vld [vmem:[#allocation3 + $0xd8] sm:$0xff] }
 0x182   : > { %1369 = vmatpush2.msra.mxu0 %v349_v47  ;;  %1442 = vmatpush2.msra.mxu1 %v485_v48  ;;  %v440_v47 = vld [vmem:[#allocation3 + $0x518] sm:$0xff]  ;;  %v303_v48 = vld [vmem:[#allocation3 + $0xd0] sm:$0xff] }
 0x183   : > { %1370 = vmatprep.subr.mxu0 %v346_v49  ;;  %1443 = vmatprep.subr.mxu1 %v482_v50  ;;  %v439_v49 = vld [vmem:[#allocation3 + $0x510] sm:$0xff]  ;;  %v300_v50 = vld [vmem:[#allocation3 + $0xb8] sm:$0xff] }
 0x184   : > { %1371 = vmatpush2.msra.mxu0 %v345_v51  ;;  %1444 = vmatpush2.msra.mxu1 %v481_v52  ;;  %v436_v51 = vld [vmem:[#allocation3 + $0x4f8] sm:$0xff]  ;;  %v299_v52 = vld [vmem:[#allocation3 + $0xb0] sm:$0xff] }
 0x185   : > { %1372 = vmatprep.subr.mxu0 %v342_v53  ;;  %1445 = vmatprep.subr.mxu1 %v478_v54  ;;  %v435_v53 = vld [vmem:[#allocation3 + $0x4f0] sm:$0xff]  ;;  %v296_v54 = vld [vmem:[#allocation3 + $0x98] sm:$0xff] }
 0x186   : > { %1373 = vmatpush2.msra.mxu0 %v341_v55  ;;  %1446 = vmatpush2.msra.mxu1 %v477_v57  ;;  %v432_v55 = vld [vmem:[#allocation3 + $0x4d8] sm:$0xff]  ;;  %v295_v57 = vld [vmem:[#allocation3 + $0x90] sm:$0xff] }
 0x187   : > { %1447 = vmatprep.subr.mxu1 %v474_v58  ;;  %1464 = vmatprep.subr.mxu0 %v340_v59  ;;  %v431_v58 = vld [vmem:[#allocation3 + $0x4d0] sm:$0xff]  ;;  %v292_v59 = vld [vmem:[#allocation3 + $0x78] sm:$0xff] }
 0x188   : > { %1448 = vmatpush2.msra.mxu1 %v473_v60  ;;  %1622 = vperm.xlu0 %1923, %v1618_v0   ;;  %v428_v60 = vld [vmem:[#allocation3 + $0x4b8] sm:$0xff] }
 0x189   : > { %1449 = vmatprep.subr.mxu1 %v470_v61  ;;  %v291_v61 = vld [vmem:[#allocation3 + $0x70] sm:$0xff]  ;;  %v424_v0 = vld [vmem:[#allocation3 + $0x498] sm:$0xff] }
 0x18a   : > { %1450 = vmatpush2.msra.mxu1 %v469_v62  ;;  %v427_v62 = vld [vmem:[#allocation3 + $0x4b0] sm:$0xff] }
 0x18b   : > { %1541 = vmatprep.subr.mxu1 %v468_v63  ;;  %v288_v63 = vld [vmem:[#allocation3 + $0x58] sm:$0xff] }
 0x205   : > { %v2374_v2 = vpop.f32.mrf.mxu0 }
 0x206   : > { %v1302_v5 = vmax.f32 %v2374_v2, 0.0 }
 0x207   : > { %v1216_v3 = vpop.f32.mrf.mxu0 }
 0x208   : > { %v1303_v4 = vmax.f32 %v1216_v3, 0.0  ;;  %v287_v3 = vld [vmem:[#allocation3 + $0x50] sm:$0xff] }
 0x209   : > { %v2377_v6 = vpop.f32.mrf.mxu1 }
 0x20a   : > { %1374 = vmatprep.mubr.f32.mxu0 %v1303_v4  ;;  %v1304_v11 = vmax.f32 %v2377_v6, 0.0 }
 0x20b   : > { %v1293_v14 = vpop.f32.mrf.mxu1  ;;  %1375 = vmatmul.mubr.f32.vlgmr.msra.gmra.mxu0 %v1302_v5 }
 0x20c   : > { %v1305_v9 = vmax.f32 %v1293_v14, 0.0  ;;  %1465 = vmatpush1.msra.mxu0 %v339_v7  ;;  %v284_v7 = vld [vmem:[#allocation3 + $0x38] sm:$0xff]  ;;  %v283_v14 = vld [vmem:[#allocation3 + $0x30] sm:$0xff] }
 0x20d   : > { %v2382_v12 = vpop.f32.mrf.mxu0  ;;  %1466 = vmatprep.subr.mxu0 %v336_v1  ;;  %v2384_v13 = vpop.f32.mrf.mxu1  ;;  %v420_v1 = vld [vmem:[#allocation3 + $0x478] sm:$0xff] }
 0x20e   : > { %1467 = vmatpush1.msra.mxu0 %v335_v8  ;;  %1451 = vmatprep.mubr.f32.mxu1 %v1305_v9  ;;  %v1306_v24 = vmax.f32 %v2382_v12, 0.0  ;;  %v1308_v27 = vmax.f32 %v2384_v13, 0.0  ;;  %v419_v8 = vld [vmem:[#allocation3 + $0x470] sm:$0xff] }
 0x20f   : > { %v2386_v18 = vpop.f32.mrf.mxu0  ;;  %1468 = vmatprep.subr.mxu0 %v332_v10  ;;  %v2388_v19 = vpop.f32.mrf.mxu1  ;;  %1452 = vmatmul.mubr.f32.vlgmr.msra.gmra.mxu1 %v1304_v11  ;;  %v416_v10 = vld [vmem:[#allocation3 + $0x458] sm:$0xff] }
 0x210   : > { %v1307_v21 = vmax.f32 %v2386_v18, 0.0  ;;  %v1309_v22 = vmax.f32 %v2388_v19, 0.0  ;;  %1469 = vmatpush1.msra.mxu0 %v331_v15  ;;  %1542 = vmatpush1.msra.mxu1 %v467_v56  ;;  %v279_v15 = vld [vmem:[#allocation3 + $0x10] sm:$0xff] }
 0x211   : > { %1470 = vmatprep.subr.mxu0 %v328_v16  ;;  %1543 = vmatprep.subr.mxu1 %v464_v17  ;;  %v415_v56 = vld [vmem:[#allocation3 + $0x450] sm:$0xff]  ;;  %v404_v16 = vld [vmem:[#allocation3 + $0x3f8] sm:$0xff] }
 0x212   : > { %1380 = vmatprep.mubr.f32.mxu0 %v1307_v21  ;;  %1471 = vmatpush1.msra.mxu0 %v327_v20  ;;  %v412_v17 = vld [vmem:[#allocation3 + $0x438] sm:$0xff]  ;;  %v403_v20 = vld [vmem:[#allocation3 + $0x3f0] sm:$0xff] }
 0x213   : > { %1544 = vmatpush1.msra.mxu1 %v463_v23  ;;  %1381 = vmatmul.mubr.f32.gmra.mxu0 %v1306_v24  ;;  %v411_v23 = vld [vmem:[#allocation3 + $0x430] sm:$0xff] }
 0x214   : > { %1457 = vmatprep.mubr.f32.mxu1 %v1309_v22  ;;  %1472 = vmatprep.subr.mxu0 %v324_v25  ;;  %v400_v25 = vld [vmem:[#allocation3 + $0x3d8] sm:$0xff] }
 0x215   : > { %1545 = vmatprep.subr.mxu1 %v460_v26  ;;  %1458 = vmatmul.mubr.f32.gmra.mxu1 %v1308_v27  ;;  %v408_v26 = vld [vmem:[#allocation3 + $0x418] sm:$0xff] }
 0x216   : > { %1473 = vmatpush1.msra.mxu0 %v323_v28  ;;  %1528 = vmatprep.mubr.f32.mxu0 %v1303_v4  ;;  %v423_v4 = vld [vmem:[#allocation3 + $0x490] sm:$0xff] }
 0x217   : > { %1546 = vmatpush1.msra.mxu1 %v459_v29  ;;  %1474 = vmatprep.subr.mxu0 %v320_v30  ;;  %v399_v28 = vld [vmem:[#allocation3 + $0x3d0] sm:$0xff]  ;;  %v396_v30 = vld [vmem:[#allocation3 + $0x3b8] sm:$0xff] }
 0x218   : > { %1547 = vmatprep.subr.mxu1 %v456_v31  ;;  %1605 = vmatprep.mubr.f32.mxu1 %v1305_v9  ;;  %v280_v9 = vld [vmem:[#allocation3 + $0x18] sm:$0xff]  ;;  %v407_v29 = vld [vmem:[#allocation3 + $0x410] sm:$0xff] }
 0x219   : > { %1475 = vmatpush1.msra.mxu0 %v319_v32  ;;  %1548 = vmatpush1.msra.mxu1 %v455_v33  ;;  %v532_v31 = vld [vmem:[#allocation3 + $0x7f8] sm:$0xff]  ;;  %v395_v32 = vld [vmem:[#allocation3 + $0x3b0] sm:$0xff] }
 0x21a   : > { %1476 = vmatprep.subr.mxu0 %v316_v34  ;;  %1549 = vmatprep.subr.mxu1 %v452_v35  ;;  %v531_v33 = vld [vmem:[#allocation3 + $0x7f0] sm:$0xff]  ;;  %v392_v34 = vld [vmem:[#allocation3 + $0x398] sm:$0xff] }
 0x21b   : > { %1477 = vmatpush1.msra.mxu0 %v315_v36  ;;  %1550 = vmatpush1.msra.mxu1 %v451_v37  ;;  %v528_v35 = vld [vmem:[#allocation3 + $0x7d8] sm:$0xff]  ;;  %v391_v36 = vld [vmem:[#allocation3 + $0x390] sm:$0xff] }
 0x21c   : > { %1478 = vmatprep.subr.mxu0 %v312_v38  ;;  %1551 = vmatprep.subr.mxu1 %v448_v39  ;;  %v527_v37 = vld [vmem:[#allocation3 + $0x7d0] sm:$0xff]  ;;  %v388_v38 = vld [vmem:[#allocation3 + $0x378] sm:$0xff] }
 0x21d   : > { %1479 = vmatpush1.msra.mxu0 %v311_v40  ;;  %1552 = vmatpush1.msra.mxu1 %v447_v41  ;;  %v524_v39 = vld [vmem:[#allocation3 + $0x7b8] sm:$0xff]  ;;  %v387_v40 = vld [vmem:[#allocation3 + $0x370] sm:$0xff] }
 0x21e   : > { %1480 = vmatprep.subr.mxu0 %v308_v42  ;;  %1553 = vmatprep.subr.mxu1 %v444_v43  ;;  %v523_v41 = vld [vmem:[#allocation3 + $0x7b0] sm:$0xff]  ;;  %v384_v42 = vld [vmem:[#allocation3 + $0x358] sm:$0xff] }
 0x21f   : > { %1481 = vmatpush1.msra.mxu0 %v307_v44  ;;  %1554 = vmatpush1.msra.mxu1 %v443_v45  ;;  %v520_v43 = vld [vmem:[#allocation3 + $0x798] sm:$0xff]  ;;  %v383_v44 = vld [vmem:[#allocation3 + $0x350] sm:$0xff] }
 0x220   : > { %1482 = vmatprep.subr.mxu0 %v304_v46  ;;  %1555 = vmatprep.subr.mxu1 %v440_v47  ;;  %v519_v45 = vld [vmem:[#allocation3 + $0x790] sm:$0xff]  ;;  %v380_v46 = vld [vmem:[#allocation3 + $0x338] sm:$0xff] }
 0x221   : > { %1483 = vmatpush1.msra.mxu0 %v303_v48  ;;  %1556 = vmatpush1.msra.mxu1 %v439_v49  ;;  %v516_v47 = vld [vmem:[#allocation3 + $0x778] sm:$0xff]  ;;  %v379_v48 = vld [vmem:[#allocation3 + $0x330] sm:$0xff] }
 0x222   : > { %1484 = vmatprep.subr.mxu0 %v300_v50  ;;  %1557 = vmatprep.subr.mxu1 %v436_v51  ;;  %v515_v49 = vld [vmem:[#allocation3 + $0x770] sm:$0xff]  ;;  %v376_v50 = vld [vmem:[#allocation3 + $0x318] sm:$0xff] }
 0x223   : > { %1485 = vmatpush1.msra.mxu0 %v299_v52  ;;  %1558 = vmatpush1.msra.mxu1 %v435_v53  ;;  %v512_v51 = vld [vmem:[#allocation3 + $0x758] sm:$0xff]  ;;  %v375_v52 = vld [vmem:[#allocation3 + $0x310] sm:$0xff] }
 0x224   : > { %1486 = vmatprep.subr.mxu0 %v296_v54  ;;  %1559 = vmatprep.subr.mxu1 %v432_v55  ;;  %v511_v53 = vld [vmem:[#allocation3 + $0x750] sm:$0xff]  ;;  %v372_v54 = vld [vmem:[#allocation3 + $0x2f8] sm:$0xff] }
 0x225   : > { %1487 = vmatpush1.msra.mxu0 %v295_v57  ;;  %1560 = vmatpush1.msra.mxu1 %v431_v58  ;;  %v508_v55 = vld [vmem:[#allocation3 + $0x738] sm:$0xff]  ;;  %v371_v57 = vld [vmem:[#allocation3 + $0x2f0] sm:$0xff] }
 0x226   : > { %1488 = vmatprep.subr.mxu0 %v292_v59  ;;  %1561 = vmatprep.subr.mxu1 %v428_v60  ;;  %v507_v58 = vld [vmem:[#allocation3 + $0x730] sm:$0xff]  ;;  %v368_v59 = vld [vmem:[#allocation3 + $0x2d8] sm:$0xff] }
 0x227   : > { %1489 = vmatpush1.msra.mxu0 %v291_v61  ;;  %1562 = vmatpush1.msra.mxu1 %v427_v62  ;;  %v504_v60 = vld [vmem:[#allocation3 + $0x718] sm:$0xff]  ;;  %v367_v61 = vld [vmem:[#allocation3 + $0x2d0] sm:$0xff] }
 0x228   : > { %1490 = vmatprep.subr.mxu0 %v288_v63  ;;  %1563 = vmatprep.subr.mxu1 %v424_v0  ;;  %v503_v62 = vld [vmem:[#allocation3 + $0x710] sm:$0xff]  ;;  %v364_v63 = vld [vmem:[#allocation3 + $0x2b8] sm:$0xff] }
 0x229   : > { %1491 = vmatpush1.msra.mxu0 %v287_v3  ;;  %1564 = vmatpush1.msra.mxu1 %v423_v4  ;;  %v500_v0 = vld [vmem:[#allocation3 + $0x6f8] sm:$0xff]  ;;  %v363_v3 = vld [vmem:[#allocation3 + $0x2b0] sm:$0xff] }
 0x22a   : > { %1492 = vmatprep.subr.mxu0 %v284_v7  ;;  %1565 = vmatprep.subr.mxu1 %v420_v1  ;;  %v499_v4 = vld [vmem:[#allocation3 + $0x6f0] sm:$0xff]  ;;  %v360_v7 = vld [vmem:[#allocation3 + $0x298] sm:$0xff] }
 0x22b   : > { %1493 = vmatpush1.msra.mxu0 %v283_v14  ;;  %1566 = vmatpush1.msra.mxu1 %v419_v8  ;;  %v496_v1 = vld [vmem:[#allocation3 + $0x6d8] sm:$0xff]  ;;  %v359_v14 = vld [vmem:[#allocation3 + $0x290] sm:$0xff] }
 0x22c   : > { %1494 = vmatprep.subr.mxu0 %v280_v9  ;;  %1567 = vmatprep.subr.mxu1 %v416_v10  ;;  %v495_v8 = vld [vmem:[#allocation3 + $0x6d0] sm:$0xff]  ;;  %v356_v9 = vld [vmem:[#allocation3 + $0x278] sm:$0xff] }
 0x22d   : > { %1495 = vmatpush1.msra.mxu0 %v279_v15  ;;  %1568 = vmatpush1.msra.mxu1 %v415_v56  ;;  %v492_v10 = vld [vmem:[#allocation3 + $0x6b8] sm:$0xff]  ;;  %v355_v15 = vld [vmem:[#allocation3 + $0x270] sm:$0xff] }
 0x22e   : > { %1496 = vmatprep.subr.mxu0 %v404_v16  ;;  %1569 = vmatprep.subr.mxu1 %v412_v17  ;;  %v491_v56 = vld [vmem:[#allocation3 + $0x6b0] sm:$0xff]  ;;  %v352_v16 = vld [vmem:[#allocation3 + $0x258] sm:$0xff] }
 0x22f   : > { %1497 = vmatpush2.msra.mxu0 %v403_v20  ;;  %1570 = vmatpush1.msra.mxu1 %v411_v23  ;;  %v488_v17 = vld [vmem:[#allocation3 + $0x698] sm:$0xff]  ;;  %v351_v20 = vld [vmem:[#allocation3 + $0x250] sm:$0xff] }
 0x230   : > { %1498 = vmatprep.subr.mxu0 %v400_v25  ;;  %1571 = vmatprep.subr.mxu1 %v408_v26  ;;  %v487_v23 = vld [vmem:[#allocation3 + $0x690] sm:$0xff]  ;;  %v348_v25 = vld [vmem:[#allocation3 + $0x238] sm:$0xff] }
 0x231   : > { %1499 = vmatpush2.msra.mxu0 %v399_v28  ;;  %1572 = vmatpush1.msra.mxu1 %v407_v29  ;;  %v484_v26 = vld [vmem:[#allocation3 + $0x678] sm:$0xff]  ;;  %v347_v28 = vld [vmem:[#allocation3 + $0x230] sm:$0xff] }
 0x232   : > { %1500 = vmatprep.subr.mxu0 %v396_v30  ;;  %1573 = vmatprep.subr.mxu1 %v532_v31  ;;  %v483_v29 = vld [vmem:[#allocation3 + $0x670] sm:$0xff]  ;;  %v344_v30 = vld [vmem:[#allocation3 + $0x218] sm:$0xff] }
 0x233   : > { %1501 = vmatpush2.msra.mxu0 %v395_v32  ;;  %1574 = vmatpush2.msra.mxu1 %v531_v33  ;;  %v480_v31 = vld [vmem:[#allocation3 + $0x658] sm:$0xff]  ;;  %v343_v32 = vld [vmem:[#allocation3 + $0x210] sm:$0xff] }
 0x234   : > { %1502 = vmatprep.subr.mxu0 %v392_v34  ;;  %1575 = vmatprep.subr.mxu1 %v528_v35  ;;  %v479_v33 = vld [vmem:[#allocation3 + $0x650] sm:$0xff]  ;;  %v476_v34 = vld [vmem:[#allocation3 + $0x638] sm:$0xff] }
 0x235   : > { %1503 = vmatpush2.msra.mxu0 %v391_v36  ;;  %1576 = vmatpush2.msra.mxu1 %v527_v37  ;;  %v475_v35 = vld [vmem:[#allocation3 + $0x630] sm:$0xff]  ;;  %v472_v36 = vld [vmem:[#allocation3 + $0x618] sm:$0xff] }
 0x236   : > { %1504 = vmatprep.subr.mxu0 %v388_v38  ;;  %1577 = vmatprep.subr.mxu1 %v524_v39  ;;  %v471_v37 = vld [vmem:[#allocation3 + $0x610] sm:$0xff]  ;;  %v2416_v38 = vpop.permute.xlu0 %1622 }
 0x237   : > { %1505 = vmatpush2.msra.mxu0 %v387_v40  ;;  %1578 = vmatpush2.msra.mxu1 %v523_v41 }
 0x238   : > { %1506 = vmatprep.subr.mxu0 %v384_v42  ;;  %1579 = vmatprep.subr.mxu1 %v520_v43  ;;  %v2420_v42 = vpop.permute.xlu1 %1627 }
 0x239   : > { %1507 = vmatpush2.msra.mxu0 %v383_v44  ;;  %1580 = vmatpush2.msra.mxu1 %v519_v45 }
 0x23a   : > { %1508 = vmatprep.subr.mxu0 %v380_v46  ;;  %1581 = vmatprep.subr.mxu1 %v516_v47 }
 0x23b   : > { %1509 = vmatpush2.msra.mxu0 %v379_v48  ;;  %1582 = vmatpush2.msra.mxu1 %v515_v49 }
 0x23c   : > { %1510 = vmatprep.subr.mxu0 %v376_v50  ;;  %1583 = vmatprep.subr.mxu1 %v512_v51 }
 0x23d   : > { %1511 = vmatpush2.msra.mxu0 %v375_v52  ;;  %1584 = vmatpush2.msra.mxu1 %v511_v53 }
 0x23e   : > { %1512 = vmatprep.subr.mxu0 %v372_v54  ;;  %1585 = vmatprep.subr.mxu1 %v508_v55 }
 0x23f   : > { %1513 = vmatpush2.msra.mxu0 %v371_v57  ;;  %1586 = vmatpush2.msra.mxu1 %v507_v58 }
 0x240   : > { %1514 = vmatprep.subr.mxu0 %v368_v59  ;;  %1587 = vmatprep.subr.mxu1 %v504_v60 }
 0x241   : > { %1515 = vmatpush2.msra.mxu0 %v367_v61  ;;  %1588 = vmatpush2.msra.mxu1 %v503_v62 }
 0x242   : > { %1516 = vmatprep.subr.mxu0 %v364_v63  ;;  %1589 = vmatprep.subr.mxu1 %v500_v0 }
 0x243   : > { %1517 = vmatpush2.msra.mxu0 %v363_v3  ;;  %1590 = vmatpush2.msra.mxu1 %v499_v4 }
 0x244   : > { %1518 = vmatprep.subr.mxu0 %v360_v7  ;;  %1591 = vmatprep.subr.mxu1 %v496_v1 }
 0x245   : > { %1519 = vmatpush2.msra.mxu0 %v359_v14  ;;  %1592 = vmatpush2.msra.mxu1 %v495_v8 }
 0x246   : > { %1520 = vmatprep.subr.mxu0 %v356_v9  ;;  %1593 = vmatprep.subr.mxu1 %v492_v10 }
 0x247   : > { %1521 = vmatpush2.msra.mxu0 %v355_v15  ;;  %1594 = vmatpush2.msra.mxu1 %v491_v56 }
 0x248   : > { %1522 = vmatprep.subr.mxu0 %v352_v16  ;;  %1595 = vmatprep.subr.mxu1 %v488_v17 }
 0x249   : > { %1523 = vmatpush2.msra.mxu0 %v351_v20  ;;  %1596 = vmatpush2.msra.mxu1 %v487_v23 }
 0x24a   : > { %1524 = vmatprep.subr.mxu0 %v348_v25  ;;  %1597 = vmatprep.subr.mxu1 %v484_v26 }
 0x24b   : > { %1525 = vmatpush2.msra.mxu0 %v347_v28  ;;  %1598 = vmatpush2.msra.mxu1 %v483_v29 }
 0x24c   : > { %1526 = vmatprep.subr.mxu0 %v344_v30  ;;  %1599 = vmatprep.subr.mxu1 %v480_v31 }
 0x24d   : > { %1527 = vmatpush2.msra.mxu0 %v343_v32  ;;  %1600 = vmatpush2.msra.mxu1 %v479_v33 }
 0x24e   : > { %1529 = vmatmul.mubr.f32.vlgmr.msra.gmra.mxu0 %v1302_v5  ;;  %1601 = vmatprep.subr.mxu1 %v476_v34 }
 0x24f   : > { %1534 = vmatprep.mubr.f32.mxu0 %v1307_v21  ;;  %1602 = vmatpush2.msra.mxu1 %v475_v35 }
 0x250   : > { %1603 = vmatprep.subr.mxu1 %v472_v36 }
 0x251   : > { %1604 = vmatpush2.msra.mxu1 %v471_v37 }
 0x252   : > { %1535 = vmatmul.mubr.f32.gmra.mxu0 %v1306_v24  ;;  %1606 = vmatmul.mubr.f32.vlgmr.msra.gmra.mxu1 %v1304_v11 }
 0x253   : > { %1611 = vmatprep.mubr.f32.mxu1 %v1309_v22 }
 0x256   : > { %1612 = vmatmul.mubr.f32.gmra.mxu1 %v1308_v27 }
 0x2cb   : > { %v1376_v2 = vpop.f32.mrf.mxu0 }
 0x2cd   : > { %v1378_v21 = vpop.f32.mrf.mxu0 }
 0x2cf   : > { %v1453_v5 = vpop.f32.mrf.mxu1 }
 0x2d0   : > { %v1454_v18 = vadd.f32 %v1453_v5, %v1376_v2 }
 0x2d1   : > { %v1455_v39 = vpop.f32.mrf.mxu1 }
 0x2d2   : > { %v1630_v40 = vmul.f32 %v2416_v38, %v1454_v18  ;;  %v1456_v12 = vadd.f32 %v1455_v39, %v1378_v21 }
 0x2d3   : > { %v1382_v24 = vpop.f32.mrf.mxu0 }
 0x2d4   : > { %v1638_v41 = vadd.f32 1.0, %v1630_v40  ;;  %v1631_v6 = vmul.f32 %v2416_v38, %v1456_v12  ;;  %v1641_v47 = vmul.f32 -0.5, %v1630_v40  ;;  %v1644_v51 = vand.u32 2147483647, %v1630_v40 }
 0x2d5   : > { %v1459_v11 = vpop.f32.mrf.mxu1  ;;  %v1384_v19 = vpop.f32.mrf.mxu0 }
 0x2d6   : > { %1924 = vlog2.f32 %v1638_v41  ;;  %v1647_v13 = vadd.f32 1.0, %v1631_v6  ;;  %v1460_v22 = vadd.f32 %v1459_v11, %v1382_v24  ;;  %v1650_v49 = vmul.f32 -0.5, %v1631_v6 }
 0x2d7   : > { %v1461_v27 = vpop.f32.mrf.mxu1  ;;  %v1642_v50 = vadd.f32 1.0, %v1641_v47  ;;  %v1653_v54 = vand.u32 2147483647, %v1631_v6  ;;  %vm1645_vm0 = vcmp.lt.f32.partialorder %v1644_v51, 0.0004427343 }
 0x2d8   : > { %1926 = vlog2.f32 %v1647_v13  ;;  %v1462_v43 = vadd.f32 %v1461_v27, %v1384_v19  ;;  %v1634_v44 = vmul.f32 %v2420_v42, %v1460_v22  ;;  %v1651_v52 = vadd.f32 1.0, %v1650_v49 }
 0x2d9   : > { %v1643_v58 = vmul.f32 %v1642_v50, %v1630_v40  ;;  %vm1654_vm1 = vcmp.lt.f32.partialorder %v1653_v54, 0.0004427343 }
 0x2da   : > { %v1635_v45 = vmul.f32 %v2420_v42, %v1462_v43  ;;  %v1674_v46 = vadd.f32 1.0, %v1634_v44  ;;  %v1677_v55 = vmul.f32 -0.5, %v1634_v44  ;;  %v1652_v63 = vmul.f32 %v1651_v52, %v1631_v6 }
 0x2db   : > { %v1680_v4 = vand.u32 2147483647, %v1634_v44 }
 0x2dc   : > { %v1683_v48 = vadd.f32 1.0, %v1635_v45  ;;  %1928 = vlog2.f32 %v1674_v46  ;;  %v1686_v59 = vmul.f32 -0.5, %v1635_v45  ;;  %v1678_v0 = vadd.f32 1.0, %v1677_v55 }
 0x2dd   : > { %v1689_v1 = vand.u32 2147483647, %v1635_v45  ;;  %vm1681_vm2 = vcmp.lt.f32.partialorder %v1680_v4, 0.0004427343 }
 0x2de   : > { %1930 = vlog2.f32 %v1683_v48  ;;  %v1687_v7 = vadd.f32 1.0, %v1686_v59  ;;  %v1679_v10 = vmul.f32 %v1678_v0, %v1634_v44 }
 0x2df   : > { %vm1690_vm3 = vcmp.lt.f32.partialorder %v1689_v1, 0.0004427343 }
 0x2e0   : > { %v1688_v56 = vmul.f32 %v1687_v7, %v1635_v45 }
 0x2e3   : > { %v1925_v53 = vpop.eup %1924 }
 0x2e4   : > { %v1640_v57 = vmul.f32 0.6931472, %v1925_v53 }
 0x2e5   : > { %v1927_v60 = vpop.eup %1926 }
 0x2e6   : > { %v1646_v61 = vsel %vm1645_vm0, %v1643_v58, %v1640_v57  ;;  %v1649_v62 = vmul.f32 0.6931472, %v1927_v60 }
 0x2e7   : > { %1710 = vst [vmem:[%s2427_s16] sm:$0xff] %v1646_v61 }
 0x2e8   : > { %v1655_v3 = vsel %vm1654_vm1, %v1652_v63, %v1649_v62 }
 0x2e9   : > { %1711 = vst [vmem:[%s2427_s16 + $0x8] sm:$0xff] %v1655_v3  ;;  %v1929_v14 = vpop.eup %1928 }
 0x2ea   : > { %v1676_v9 = vmul.f32 0.6931472, %v1929_v14 }
 0x2eb   : > { %v1931_v8 = vpop.eup %1930 }
 0x2ec   : > { %v1685_v15 = vmul.f32 0.6931472, %v1931_v8  ;;  %v1682_v16 = vsel %vm1681_vm2, %v1679_v10, %v1676_v9 }
 0x2ed   : > { %1714 = vst [vmem:[%s2427_s16 + $0x20] sm:$0xff] %v1682_v16 }
 0x2ee   : > { %v1691_v17 = vsel %vm1690_vm3, %v1688_v56, %v1685_v15 }
 0x2ef   : > { %1715 = vst [vmem:[%s2427_s16 + $0x28] sm:$0xff] %v1691_v17 }
 0x30e   : > { %v1530_v20 = vpop.f32.mrf.mxu0 }
 0x310   : > { %v1532_v23 = vpop.f32.mrf.mxu0 }
 0x312   : > { %v1607_v25 = vpop.f32.mrf.mxu1  ;;  %v1536_v29 = vpop.f32.mrf.mxu0 }
 0x313   : > { %v1608_v26 = vadd.f32 %v1607_v25, %v1530_v20 }
 0x314   : > { %v1609_v28 = vpop.f32.mrf.mxu1  ;;  %v1538_v37 = vpop.f32.mrf.mxu0 }
 0x315   : > { %v1632_v30 = vmul.f32 %v2416_v38, %v1608_v26  ;;  %v1610_v31 = vadd.f32 %v1609_v28, %v1532_v23 }
 0x316   : > { %v1613_v32 = vpop.f32.mrf.mxu1 }
 0x317   : > { %v1656_v33 = vadd.f32 1.0, %v1632_v30  ;;  %v1633_v34 = vmul.f32 %v2416_v38, %v1610_v31  ;;  %v1614_v35 = vadd.f32 %v1613_v32, %v1536_v29  ;;  %v1659_v40 = vmul.f32 -0.5, %v1632_v30 }
 0x318   : > { %v1615_v36 = vpop.f32.mrf.mxu1  ;;  %v1662_v38 = vand.u32 2147483647, %v1632_v30 }
 0x319   : > { %1932 = vlog2.f32 %v1656_v33  ;;  %v1665_v2 = vadd.f32 1.0, %v1633_v34  ;;  %v1636_v5 = vmul.f32 %v2420_v42, %v1614_v35  ;;  %v1616_v18 = vadd.f32 %v1615_v36, %v1538_v37 }
 0x31a   : > { %v1668_v24 = vmul.f32 -0.5, %v1633_v34  ;;  %v1660_v41 = vadd.f32 1.0, %v1659_v40  ;;  %v1671_v13 = vand.u32 2147483647, %v1633_v34  ;;  %vm1663_vm4 = vcmp.lt.f32.partialorder %v1662_v38, 0.0004427343 }
 0x31b   : > { %1934 = vlog2.f32 %v1665_v2  ;;  %v1692_v21 = vadd.f32 1.0, %v1636_v5  ;;  %v1637_v39 = vmul.f32 %v2420_v42, %v1616_v18  ;;  %v1695_v6 = vmul.f32 -0.5, %v1636_v5 }
 0x31c   : > { %v1669_v11 = vadd.f32 1.0, %v1668_v24  ;;  %v1661_v27 = vmul.f32 %v1660_v41, %v1632_v30  ;;  %v1698_v48 = vand.u32 2147483647, %v1636_v5  ;;  %vm1672_vm5 = vcmp.lt.f32.partialorder %v1671_v13, 0.0004427343 }
 0x31d   : > { %1936 = vlog2.f32 %v1692_v21  ;;  %v1701_v12 = vadd.f32 1.0, %v1637_v39  ;;  %v1704_v43 = vmul.f32 -0.5, %v1637_v39  ;;  %v1696_v42 = vadd.f32 1.0, %v1695_v6 }
 0x31e   : > { %v1670_v47 = vmul.f32 %v1669_v11, %v1633_v34  ;;  %v1707_v54 = vand.u32 2147483647, %v1637_v39  ;;  %vm1699_vm6 = vcmp.lt.f32.partialorder %v1698_v48, 0.0004427343 }
 0x31f   : > { %1938 = vlog2.f32 %v1701_v12  ;;  %v1705_v51 = vadd.f32 1.0, %v1704_v43  ;;  %v1697_v53 = vmul.f32 %v1696_v42, %v1636_v5 }
 0x320   : > { %vm1708_vm7 = vcmp.lt.f32.partialorder %v1707_v54, 0.0004427343 }
 0x321   : > { %v1706_v59 = vmul.f32 %v1705_v51, %v1637_v39 }
 0x326   : > { %v1933_v19 = vpop.eup %1932 }
 0x327   : > { %v1658_v22 = vmul.f32 0.6931472, %v1933_v19 }
 0x328   : > { %v1935_v44 = vpop.eup %1934 }
 0x329   : > { %v1664_v45 = vsel %vm1663_vm4, %v1661_v27, %v1658_v22  ;;  %v1667_v46 = vmul.f32 0.6931472, %v1935_v44 }
 0x32a   : > { %1712 = vst [vmem:[%s2427_s16 + $0x10] sm:$0xff] %v1664_v45  ;;  %v1937_v49 = vpop.eup %1936 }
 0x32b   : > { %v1673_v50 = vsel %vm1672_vm5, %v1670_v47, %v1667_v46  ;;  %v1694_v52 = vmul.f32 0.6931472, %v1937_v49 }
 0x32c   : > { %1713 = vst [vmem:[%s2427_s16 + $0x18] sm:$0xff] %v1673_v50  ;;  %v1939_v55 = vpop.eup %1938 }
 0x32d   : > { %v1700_v57 = vsel %vm1699_vm6, %v1697_v53, %v1694_v52  ;;  %v1703_v58 = vmul.f32 0.6931472, %v1939_v55 }
 0x32e   : > { %1716 = vst [vmem:[%s2427_s16 + $0x30] sm:$0xff] %v1700_v57 }
 0x32f   : > { %v1709_v60 = vsel %vm1708_vm7, %v1706_v59, %v1703_v58 }
 0x330   : > { %1717 = vst [vmem:[%s2427_s16 + $0x38] sm:$0xff] %v1709_v60 }
 0x331   : > { %1979 = shalt.err (!%p1976_p0)
}
 0x332   : > { %s1980_s13 = scalar_lea.hbm %s2445_s30, 1024  ;;  %s1984_s12 = scalar_lea.hbm %s2497_s5, 2048 }
 0x333   : > { %p1981_p1 = scmp.ne.s32.totalorder %s2445_s30, %s1980_s13  ;;  %p1985_p4 = scmp.lt.s32.totalorder %s2445_s30, %s2497_s5 }
 0x334   : > { %p1986_p7 = scmp.lt.s32.totalorder %s1984_s12, %s1980_s13 }
 0x335   : > { %p1982_p2 = pnand %p1981_p1, %p2124_p5 }
 0x336   : > { %p1987_p8 = por %p1986_p7, %p1985_p4 }
 0x337   : > { %p1983_p3 = pneg %p1982_p2 }
 0x339   : > { %p1988_p6 = pnand %p1987_p8, %p1983_p3 }
 0x33b   : > { %1991 = shalt.err (!%p1988_p6)
}
 0x33c   : > { %s2054_s16 = smov 512   ;;  %s2055_s17 = smov 32  }
 0x33d   : > { %1854 = dma.vmem_to_hbm [thread:$0]  (%p2124_p5), %s2447_s23, 1024, %s2445_s30, %s2452_s22, %s2054_s16, %s2054_s16, %s2055_s17  }
 0x33e PF: > { %p1866_p9 = scmp.ge.s32.totalorder %s2030_s21, 2  ;;  %s1747_s25 = sand.u32 1, %s2018_s18  }
 0x33f   : > { %p2501_p10 = scmp.ne.s32.totalorder %s2499_s29, 0  ;;  %s1748_s26 = scalar_lea.sflag [#allocation5], %s1747_s25 }
 0x341   : > { %p1861_p11 = pnand %p1866_p9, %p2501_p10 }
 0x343   : > { %p1862_p12 = pneg %p1861_p11 }
 0x345   : > { %2013 = dma.done.wait (%p1862_p12), %s1748_s26, 1024  }
 0x346   : > { %2015 = vsyncadd (%p1862_p12), %s1748_s26, 4294966272  ;;  %p16_p13 = scmp.ge.s32.totalorder %s2111_s24, 4   ;;  %s2502_s18 = smov %s2022_s19 }
 0x347   : > { %s2503_s19 = smov %s2026_s20  ;;  %s2504_s20 = smov %s2122_s27 }
 0x348   : > { %s2505_s21 = smov %s2111_s24  ;;  %18 = sbr.rel (!%p16_p13) target bundleno = 4 (0x4), region = 86 }
 0x34d   :  { %1753 = vsyncpa [#allocation4], 1 }
 0x34e   :  { %1755 = vsyncpa [#allocation4 + $0x1], 1 }
 0x34f   :  { %1756 = vsyncpa [#allocation5], 1 }
 0x350   :  { %1758 = vsyncpa [#allocation5 + $0x1], 1 }

</bundles_post_ra>
